<compile_context>
chip_gen: v5e
topology: v5e:2x2
jax: 0.10.0
libtpu: 0.0.40
codegen_flags: <defaults>
</compile_context>

<pallas_src>
import functools
import math

import jax
import jax.numpy as jnp
from jax import lax
from jax.experimental import pallas as pl
from jax.experimental.pallas import tpu as pltpu

_BN_EPS = 1e-5
_TILE_M_CAP = 1024                 # v5e/v6e can go 2048; cap ~512 for 512-ch layers on v7x
_VMEM_LIMIT = 64 * 1024 * 1024     # scoped-VMEM limit; actual use is far below at test sizes

# im2col tap order: center tap (1,1) first so the fused 1x1-stride-2 downsample
# conv can read it from columns [0:cin] of the patch tile (offset-0 slice).
_TAPS3 = ((1, 1), (0, 0), (0, 1), (0, 2), (1, 0), (1, 2), (2, 0), (2, 1), (2, 2))


# ---------------------------------------------------------------------------
# helpers
# ---------------------------------------------------------------------------
def _round_up(x, m):
    return ((x + m - 1) // m) * m


def _pad_rows(a, rows):
    r = a.shape[0]
    if r == rows:
        return a
    return jnp.pad(a, ((0, rows - r), (0, 0)))


def _w_mat(w, taps):
    # (kh, kw, cin, cout) -> (len(taps)*cin, cout) bf16, rows ordered to match _im2col
    return jnp.concatenate([w[kh, kw] for kh, kw in taps], axis=0).astype(jnp.bfloat16)


def _im2col(x_nhwc, ksize, stride, padding, taps):
    n, h, w, c = x_nhwc.shape
    xp = jnp.pad(x_nhwc, ((0, 0), (padding, padding), (padding, padding), (0, 0)))
    h_out = (h + 2 * padding - ksize) // stride + 1
    w_out = (w + 2 * padding - ksize) // stride + 1
    cols = []
    for kh, kw in taps:
        patch = xp[:,
                   kh:kh + stride * h_out:stride,
                   kw:kw + stride * w_out:stride, :]
        cols.append(patch)
    cols = jnp.concatenate(cols, axis=-1)          # (N, Hout, Wout, len(taps)*C)
    return cols.reshape(n * h_out * w_out, len(taps) * c), (n, h_out, w_out)


# ---------------------------------------------------------------------------
# Pallas pass 1: tiled matmul (bf16 x bf16 -> f32 acc) + per-tile BN stats
# (optionally fused with the 1x1-stride-2 downsample conv via the center tap)
# ---------------------------------------------------------------------------
def _mm_stats_kernel(p_ref, w_ref, y_ref, st_ref):
    # p: (TM, K) bf16 patches; w: (K, C) bf16 resident weight
    # y: (TM, C) bf16 raw conv output; st: (2, C) f32 per-tile [sum; sum_sq]
    y = jnp.dot(p_ref[...], w_ref[...], preferred_element_type=jnp.float32)
    y_ref[...] = y.astype(y_ref.dtype)
    st_ref[0:1, :] = jnp.sum(y, axis=0, keepdims=True)
    st_ref[1:2, :] = jnp.sum(y * y, axis=0, keepdims=True)


def _mm_stats_ds_kernel(p_ref, w_ref, wd_ref, y_ref, st_ref, d_ref, dst_ref, *, cin):
    p = p_ref[...]
    y = jnp.dot(p, w_ref[...], preferred_element_type=jnp.float32)
    y_ref[...] = y.astype(y_ref.dtype)
    st_ref[0:1, :] = jnp.sum(y, axis=0, keepdims=True)
    st_ref[1:2, :] = jnp.sum(y * y, axis=0, keepdims=True)
    # Fused downsample: columns [0:cin] are the (1,1) center tap == x[:, ::2, ::2, :].
    pc = p[:, :cin]
    d = jnp.dot(pc, wd_ref[...], preferred_element_type=jnp.float32)
    d_ref[...] = d.astype(d_ref.dtype)
    dst_ref[0:1, :] = jnp.sum(d, axis=0, keepdims=True)
    dst_ref[1:2, :] = jnp.sum(d * d, axis=0, keepdims=True)


def _conv_pass1(patches, w_mat, tile_m, wd_mat=None, cin=None):
    mp, k = patches.shape
    c = w_mat.shape[1]
    nt = mp // tile_m

    p_spec = pl.BlockSpec((tile_m, k), lambda i: (i, 0))      # M-tiled patches
    w_spec = pl.BlockSpec((k, c), lambda i: (0, 0))           # resident weight
    y_spec = pl.BlockSpec((tile_m, c), lambda i: (i, 0))
    st_spec = pl.BlockSpec((None, 2, c), lambda i: (i, 0, 0))  # per-tile partial stats

    if wd_mat is None:
        kern = _mm_stats_kernel
        args = (patches, w_mat)
        in_specs = [p_spec, w_spec]
        out_shape = (jax.ShapeDtypeStruct((mp, c), jnp.bfloat16),
                     jax.ShapeDtypeStruct((nt, 2, c), jnp.float32))
        out_specs = [y_spec, st_spec]
        flops = 2 * mp * k * c
    else:
        kern = functools.partial(_mm_stats_ds_kernel, cin=cin)
        wd_spec = pl.BlockSpec((cin, c), lambda i: (0, 0))
        args = (patches, w_mat, wd_mat)
        in_specs = [p_spec, w_spec, wd_spec]
        out_shape = (jax.ShapeDtypeStruct((mp, c), jnp.bfloat16),
                     jax.ShapeDtypeStruct((nt, 2, c), jnp.float32),
                     jax.ShapeDtypeStruct((mp, c), jnp.bfloat16),
                     jax.ShapeDtypeStruct((nt, 2, c), jnp.float32))
        out_specs = [y_spec, st_spec, y_spec, st_spec]
        flops = 2 * mp * k * c + 2 * mp * cin * c

    in_bytes = sum(int(a.size) * a.dtype.itemsize for a in args)
    out_bytes = sum(math.prod(s.shape) * jnp.dtype(s.dtype).itemsize for s in out_shape)
    return pl.pallas_call(
        kern,
        out_shape=out_shape,
        grid_spec=pltpu.PrefetchScalarGridSpec(
            num_scalar_prefetch=0,
            grid=(nt,),
            in_specs=in_specs,
            out_specs=out_specs,
        ),
        compiler_params=pltpu.CompilerParams(
            dimension_semantics=("parallel",),    # per-tile stats -> megacore-parallel
            vmem_limit_bytes=_VMEM_LIMIT),
        cost_estimate=pl.CostEstimate(flops=int(flops), transcendentals=0,
                                      bytes_accessed=int(in_bytes + out_bytes)),
    )(*args)


# ---------------------------------------------------------------------------
# Pallas pass 2: per-tile BN affine (+ residual) (+ ReLU); f32 math, cheap I/O
# ---------------------------------------------------------------------------
def _bn_act_kernel(y_ref, sb_ref, o_ref, *, relu):
    sb = sb_ref[...]
    y = y_ref[...].astype(jnp.float32) * sb[0:1, :] + sb[1:2, :]
    if relu:
        y = jnp.maximum(y, 0.0)
    o_ref[...] = y.astype(o_ref.dtype)


def _bn_add_act_kernel(y_ref, sb_ref, r_ref, o_ref, *, relu):
    sb = sb_ref[...]
    y = y_ref[...].astype(jnp.float32) * sb[0:1, :] + sb[1:2, :]
    y = y + r_ref[...].astype(jnp.float32)
    if relu:
        y = jnp.maximum(y, 0.0)
    o_ref[...] = y.astype(o_ref.dtype)


def _bn_add_bn_act_kernel(y_ref, sb_ref, d_ref, dsb_ref, o_ref, *, relu):
    sb = sb_ref[...]
    dsb = dsb_ref[...]
    y = y_ref[...].astype(jnp.float32) * sb[0:1, :] + sb[1:2, :]
    y = y + d_ref[...].astype(jnp.float32) * dsb[0:1, :] + dsb[1:2, :]  # fused BN_d
    if relu:
        y = jnp.maximum(y, 0.0)
    o_ref[...] = y.astype(o_ref.dtype)


def _bn_pass2(y_raw, sb, tile_m, *, residual=None, res_sb=None, relu=True,
              out_dtype=jnp.float32):
    mp, c = y_raw.shape
    tile_spec = pl.BlockSpec((tile_m, c), lambda i: (i, 0))
    vec_spec = pl.BlockSpec((2, c), lambda i: (0, 0))

    args = [y_raw, sb]
    in_specs = [tile_spec, vec_spec]
    if residual is not None and res_sb is not None:
        kern = functools.partial(_bn_add_bn_act_kernel, relu=relu)
        args += [residual, res_sb]
        in_specs += [tile_spec, vec_spec]
    elif residual is not None:
        kern = functools.partial(_bn_add_act_kernel, relu=relu)
        args += [residual]
        in_specs += [tile_spec]
    else:
        kern = functools.partial(_bn_act_kernel, relu=relu)

    in_bytes = sum(int(a.size) * a.dtype.itemsize for a in args)
    out_bytes = mp * c * jnp.dtype(out_dtype).itemsize
    return pl.pallas_call(
        kern,
        out_shape=jax.ShapeDtypeStruct((mp, c), out_dtype),
        grid_spec=pltpu.PrefetchScalarGridSpec(
            num_scalar_prefetch=0,
            grid=(mp // tile_m,),
            in_specs=in_specs,
            out_specs=tile_spec,
        ),
        compiler_params=pltpu.CompilerParams(
            dimension_semantics=("parallel",),     # megacore sharding on v7x
            vmem_limit_bytes=_VMEM_LIMIT),
        cost_estimate=pl.CostEstimate(flops=6 * mp * c, transcendentals=0,
                                      bytes_accessed=int(in_bytes + out_bytes)),
    )(*args)


# ---------------------------------------------------------------------------
# BN affine parameters from global (sum, sumsq) — tiny (2, C) math, plain JAX
# ---------------------------------------------------------------------------
def _affine_from_stats(stats, m_count, gamma, beta):
    mean = stats[0] / m_count
    # TODO(synk): one-pass E[y^2]-E[y]^2 can cancel when |mean| >> std; switch to a
    # per-tile mean-centered accumulation if that regime ever shows up.
    var = jnp.maximum(stats[1] / m_count - mean * mean, 0.0)
    scale = gamma * lax.rsqrt(var + _BN_EPS)
    bias = beta - mean * scale
    return jnp.stack([scale, bias], axis=0)   # (2, C) f32


# ---------------------------------------------------------------------------
# Parameters (deterministic, synthetic). Weight layout: (kh, kw, cin, cout).
# ---------------------------------------------------------------------------
def init_params(key, insize, outsize, stride):
    k1, k2, k3 = jax.random.split(key, 3)
    scale1 = (2.0 / (9 * insize)) ** 0.5
    scale2 = (2.0 / (9 * outsize)) ** 0.5
    params = {
        "w1": jax.random.normal(k1, (3, 3, insize, outsize), jnp.float32) * scale1,
        "g1": jnp.ones((outsize,), jnp.float32),
        "b1": jnp.zeros((outsize,), jnp.float32),
        "w2": jax.random.normal(k2, (3, 3, outsize, outsize), jnp.float32) * scale2,
        "g2": jnp.ones((outsize,), jnp.float32),
        "b2": jnp.zeros((outsize,), jnp.float32),
    }
    if stride == 2:
        params["wd"] = jax.random.normal(k3, (1, 1, insize, outsize), jnp.float32) * (
            (2.0 / insize) ** 0.5)
        params["gd"] = jnp.ones((outsize,), jnp.float32)
        params["bd"] = jnp.zeros((outsize,), jnp.float32)
    return params


# ---------------------------------------------------------------------------
# Forward pass (NCHW in, NCHW out — matches the PyTorch module)
# ---------------------------------------------------------------------------
def resnet18_sub_forward(x_nchw, params, stride):
    x = jnp.transpose(x_nchw, (0, 2, 3, 1)).astype(jnp.float32)  # NHWC
    n, h, w, cin = x.shape
    cout = params["w1"].shape[-1]

    p1, (_, h1, w1) = _im2col(x.astype(jnp.bfloat16), 3, stride, 1, _TAPS3)
    m = n * h1 * w1
    tile_m = min(_TILE_M_CAP, _round_up(m, 16))
    mp = _round_up(m, tile_m)            # zero-padded rows contribute 0 to the stats
    p1 = _pad_rows(p1, mp)
    w1m = _w_mat(params["w1"], _TAPS3)

    # ---- pass 1: conv1 (3x3, stride) [+ fused 1x1-stride-2 downsample conv] -----
    if stride == 2:
        wdm = params["wd"].reshape(cin, cout).astype(jnp.bfloat16)
        y1_raw, st1_p, d_raw, dst_p = _conv_pass1(p1, w1m, tile_m, wd_mat=wdm, cin=cin)
        sbd = _affine_from_stats(dst_p.sum(axis=0), m, params["gd"], params["bd"])
    else:
        y1_raw, st1_p = _conv_pass1(p1, w1m, tile_m)
        d_raw, sbd = None, None

    sb1 = _affine_from_stats(st1_p.sum(axis=0), m, params["g1"], params["b1"])

    # ---- pass 2: BN1 + ReLU (bf16 output feeds conv2's patch extraction) --------
    y1 = _bn_pass2(y1_raw, sb1, tile_m, relu=True, out_dtype=jnp.bfloat16)
    y1 = y1[:m].reshape(n, h1, w1, cout)

    # ---- conv2 (3x3, stride 1): pass 1 -------------------------------------------
    p2, _ = _im2col(y1, 3, 1, 1, _TAPS3)
    p2 = _pad_rows(p2, mp)
    w2m = _w_mat(params["w2"], _TAPS3)
    y2_raw, st2_p = _conv_pass1(p2, w2m, tile_m)
    sb2 = _affine_from_stats(st2_p.sum(axis=0), m, params["g2"], params["b2"])

    # ---- pass 2: BN2 + residual add + ReLU ----------------------------------------
    if stride == 2:
        # residual = BN_d(downsample conv); its BN is fused into this epilogue, so
        # the normalized residual never round-trips HBM.
        out = _bn_pass2(y2_raw, sb2, tile_m, residual=d_raw, res_sb=sbd, relu=True)
    else:
        assert cin == cout, "identity residual requires insize == outsize"
        res = _pad_rows(x.reshape(m, cin).astype(jnp.bfloat16), mp)
        out = _bn_pass2(y2_raw, sb2, tile_m, residual=res, relu=True)

    out = out[:m].reshape(n, h1, w1, cout)
    return jnp.transpose(out, (0, 3, 1, 2))       # back to NCHW


# ---------------------------------------------------------------------------
# Pure-JAX f32 reference (PyTorch training-mode semantics) for tolerance check
# ---------------------------------------------------------------------------
def _reference_forward(x_nchw, params, stride):
    x = jnp.transpose(x_nchw, (0, 2, 3, 1)).astype(jnp.float32)

    def conv(v, wt, s, pad):
        return lax.conv_general_dilated(
            v, wt, window_strides=(s, s), padding=[(pad, pad), (pad, pad)],
            dimension_numbers=("NHWC", "HWIO", "NHWC"),
            precision=lax.Precision.HIGHEST)

    def bn(v, g, b):
        mean = jnp.mean(v, axis=(0, 1, 2))
        var = jnp.mean(jnp.square(v - mean), axis=(0, 1, 2))
        return (v - mean) * lax.rsqrt(var + _BN_EPS) * g + b

    y1 = jax.nn.relu(bn(conv(x, params["w1"], stride, 1), params["g1"], params["b1"]))
    y2 = bn(conv(y1, params["w2"], 1, 1), params["g2"], params["b2"])
    if stride == 2:
        d = bn(conv(x, params["wd"], 2, 0), params["gd"], params["bd"])
    else:
        d = x
    out = jax.nn.relu(y2 + d)
    return jnp.transpose(out, (0, 3, 1, 2))


if __name__ == "__main__":
    key = jax.random.PRNGKey(0)
    kx, kp1, kp2 = jax.random.split(key, 3)

    # batch=2, insize=4, outsize=8, spatial=16, stride=2 (downsample branch).
    batch, insize, outsize, spatial, stride = 2, 4, 8, 16, 2
    x = jax.random.normal(kx, (batch, insize, spatial, spatial), jnp.float32)
    params = init_params(kp1, insize, outsize, stride)

    fwd = jax.jit(resnet18_sub_forward, static_argnums=2)

    y = jax.block_until_ready(fwd(x, params, stride))
    assert y.shape == (batch, outsize, spatial // stride, spatial // stride), y.shape
    assert bool(jnp.all(y >= 0.0))                      # final ReLU
    y_ref = _reference_forward(x, params, stride)
    err1 = float(jnp.max(jnp.abs(y - y_ref)))
    # bf16 operands / bf16 intermediates vs f32 reference -> small absolute tolerance
    assert err1 < 0.15, f"stride-2 block mismatch vs f32 reference: max|diff|={err1}"

    # stride=1 / identity-residual path (insize == outsize), fed by the block above.
    params1 = init_params(kp2, outsize, outsize, 1)
    y2 = jax.block_until_ready(fwd(y, params1, 1))
    assert y2.shape == y.shape, y2.shape
    assert bool(jnp.all(y2 >= 0.0))
    y2_ref = _reference_forward(y, params1, 1)
    err2 = float(jnp.max(jnp.abs(y2 - y2_ref)))
    assert err2 < 0.15, f"stride-1 block mismatch vs f32 reference: max|diff|={err2}"

    print("KERNEL_OK")
</pallas_src>

<mosaic_0001>
module attributes {stable_mosaic.version = 11 : i64} {
  func.func @_mm_stats_ds_kernel(%arg0: i32, %arg1: memref<128x36xbf16, #tpu.memory_space<vmem>>, %arg2: memref<36x8xbf16, #tpu.memory_space<vmem>>, %arg3: memref<4x8xbf16, #tpu.memory_space<vmem>>, %arg4: memref<128x8xbf16, #tpu.memory_space<vmem>>, %arg5: memref<1x2x8xf32, #tpu.memory_space<vmem>>, %arg6: memref<128x8xbf16, #tpu.memory_space<vmem>>, %arg7: memref<1x2x8xf32, #tpu.memory_space<vmem>>) attributes {dimension_semantics = [#tpu.dimension_semantics<parallel>], iteration_bounds = array<i64: 1>, scalar_prefetch = 0 : i64, scratch_operands = 0 : i64, tpu.core_type = #tpu.core_type<tc>, window_params = [{transform_indices = @transform_0, window_bounds = array<i64: 128, 36>}, {pipeline_mode = #tpu.pipeline_mode<synchronous>, transform_indices = @transform_1, window_bounds = array<i64: 36, 8>}, {pipeline_mode = #tpu.pipeline_mode<synchronous>, transform_indices = @transform_2, window_bounds = array<i64: 4, 8>}, {transform_indices = @transform_3, window_bounds = array<i64: 128, 8>}, {transform_indices = @transform_4, window_bounds = array<i64: 1, 2, 8>}, {transform_indices = @transform_5, window_bounds = array<i64: 128, 8>}, {transform_indices = @transform_6, window_bounds = array<i64: 1, 2, 8>}]} {
    %c0 = arith.constant 0 : index
    %c0_0 = arith.constant 0 : index
    %0 = vector.load %arg1[%c0, %c0_0] : memref<128x36xbf16, #tpu.memory_space<vmem>>, vector<128x36xbf16>
    %c0_1 = arith.constant 0 : index
    %c0_2 = arith.constant 0 : index
    %1 = vector.load %arg2[%c0_1, %c0_2] : memref<36x8xbf16, #tpu.memory_space<vmem>>, vector<36x8xbf16>
    %cst = arith.constant dense<0.000000e+00> : vector<128x8xf32>
    %2 = tpu.matmul %0, %1, %cst {dimension_numbers = #tpu.dot_dimension_numbers<[1], [0], [0], [1], [0, 0, 1, 1], [], []>} : vector<128x36xbf16>, vector<36x8xbf16>, vector<128x8xf32> -> vector<128x8xf32>
    %3 = arith.truncf %2 : vector<128x8xf32> to vector<128x8xbf16>
    %c0_3 = arith.constant 0 : index
    %c0_4 = arith.constant 0 : index
    %4 = vector.load %arg4[%c0_3, %c0_4] : memref<128x8xbf16, #tpu.memory_space<vmem>>, vector<128x8xbf16>
    tpu.vector_store %arg4[%c0_3, %c0_4], %3 {strides = array<i32>} : memref<128x8xbf16, #tpu.memory_space<vmem>>, vector<128x8xbf16>,
    %cst_5 = arith.constant dense<0.000000e+00> : vector<8xf32>
    %5 = vector.multi_reduction <add>, %2, %cst_5 [0] : vector<128x8xf32> to vector<8xf32>
    %6 = vector.shape_cast %5 : vector<8xf32> to vector<1x8xf32>
    %c0_6 = arith.constant 0 : index
    %c0_7 = arith.constant 0 : index
    %c0_8 = arith.constant 0 : index
    %7 = vector.load %arg5[%c0_6, %c0_7, %c0_8] : memref<1x2x8xf32, #tpu.memory_space<vmem>>, vector<1x1x8xf32>
    %8 = vector.shape_cast %7 : vector<1x1x8xf32> to vector<1x8xf32>
    %9 = vector.shape_cast %6 : vector<1x8xf32> to vector<1x1x8xf32>
    tpu.vector_store %arg5[%c0_6, %c0_7, %c0_8], %9 {strides = array<i32>} : memref<1x2x8xf32, #tpu.memory_space<vmem>>, vector<1x1x8xf32>,
    %10 = arith.mulf %2, %2 : vector<128x8xf32>
    %cst_9 = arith.constant dense<0.000000e+00> : vector<8xf32>
    %11 = vector.multi_reduction <add>, %10, %cst_9 [0] : vector<128x8xf32> to vector<8xf32>
    %12 = vector.shape_cast %11 : vector<8xf32> to vector<1x8xf32>
    %c0_10 = arith.constant 0 : index
    %c1 = arith.constant 1 : index
    %c0_11 = arith.constant 0 : index
    %13 = vector.load %arg5[%c0_10, %c1, %c0_11] : memref<1x2x8xf32, #tpu.memory_space<vmem>>, vector<1x1x8xf32>
    %14 = vector.shape_cast %13 : vector<1x1x8xf32> to vector<1x8xf32>
    %15 = vector.shape_cast %12 : vector<1x8xf32> to vector<1x1x8xf32>
    tpu.vector_store %arg5[%c0_10, %c1, %c0_11], %15 {strides = array<i32>} : memref<1x2x8xf32, #tpu.memory_space<vmem>>, vector<1x1x8xf32>,
    %16 = vector.extract_strided_slice %0 {offsets = [0, 0], sizes = [128, 4], strides = [1, 1]} : vector<128x36xbf16> to vector<128x4xbf16>
    %c0_12 = arith.constant 0 : index
    %c0_13 = arith.constant 0 : index
    %17 = vector.load %arg3[%c0_12, %c0_13] : memref<4x8xbf16, #tpu.memory_space<vmem>>, vector<4x8xbf16>
    %cst_14 = arith.constant dense<0.000000e+00> : vector<128x8xf32>
    %18 = tpu.matmul %16, %17, %cst_14 {dimension_numbers = #tpu.dot_dimension_numbers<[1], [0], [0], [1], [0, 0, 1, 1], [], []>} : vector<128x4xbf16>, vector<4x8xbf16>, vector<128x8xf32> -> vector<128x8xf32>
    %19 = arith.truncf %18 : vector<128x8xf32> to vector<128x8xbf16>
    %c0_15 = arith.constant 0 : index
    %c0_16 = arith.constant 0 : index
    %20 = vector.load %arg6[%c0_15, %c0_16] : memref<128x8xbf16, #tpu.memory_space<vmem>>, vector<128x8xbf16>
    tpu.vector_store %arg6[%c0_15, %c0_16], %19 {strides = array<i32>} : memref<128x8xbf16, #tpu.memory_space<vmem>>, vector<128x8xbf16>,
    %cst_17 = arith.constant dense<0.000000e+00> : vector<8xf32>
    %21 = vector.multi_reduction <add>, %18, %cst_17 [0] : vector<128x8xf32> to vector<8xf32>
    %22 = vector.shape_cast %21 : vector<8xf32> to vector<1x8xf32>
    %c0_18 = arith.constant 0 : index
    %c0_19 = arith.constant 0 : index
    %c0_20 = arith.constant 0 : index
    %23 = vector.load %arg7[%c0_18, %c0_19, %c0_20] : memref<1x2x8xf32, #tpu.memory_space<vmem>>, vector<1x1x8xf32>
    %24 = vector.shape_cast %23 : vector<1x1x8xf32> to vector<1x8xf32>
    %25 = vector.shape_cast %22 : vector<1x8xf32> to vector<1x1x8xf32>
    tpu.vector_store %arg7[%c0_18, %c0_19, %c0_20], %25 {strides = array<i32>} : memref<1x2x8xf32, #tpu.memory_space<vmem>>, vector<1x1x8xf32>,
    %26 = arith.mulf %18, %18 : vector<128x8xf32>
    %cst_21 = arith.constant dense<0.000000e+00> : vector<8xf32>
    %27 = vector.multi_reduction <add>, %26, %cst_21 [0] : vector<128x8xf32> to vector<8xf32>
    %28 = vector.shape_cast %27 : vector<8xf32> to vector<1x8xf32>
    %c0_22 = arith.constant 0 : index
    %c1_23 = arith.constant 1 : index
    %c0_24 = arith.constant 0 : index
    %29 = vector.load %arg7[%c0_22, %c1_23, %c0_24] : memref<1x2x8xf32, #tpu.memory_space<vmem>>, vector<1x1x8xf32>
    %30 = vector.shape_cast %29 : vector<1x1x8xf32> to vector<1x8xf32>
    %31 = vector.shape_cast %28 : vector<1x8xf32> to vector<1x1x8xf32>
    tpu.vector_store %arg7[%c0_22, %c1_23, %c0_24], %31 {strides = array<i32>} : memref<1x2x8xf32, #tpu.memory_space<vmem>>, vector<1x1x8xf32>,
    return
  }
  func.func @transform_0(%arg0: i32) -> (i32, i32) {
    %c0_i32 = arith.constant 0 : i32
    %c0_i32_0 = arith.constant 0 : i32
    return %arg0, %c0_i32 : i32, i32
  }
  func.func @transform_1(%arg0: i32) -> (i32, i32) {
    %c0_i32 = arith.constant 0 : i32
    %c0_i32_0 = arith.constant 0 : i32
    %c0_i32_1 = arith.constant 0 : i32
    return %c0_i32, %c0_i32_0 : i32, i32
  }
  func.func @transform_2(%arg0: i32) -> (i32, i32) {
    %c0_i32 = arith.constant 0 : i32
    %c0_i32_0 = arith.constant 0 : i32
    %c0_i32_1 = arith.constant 0 : i32
    return %c0_i32, %c0_i32_0 : i32, i32
  }
  func.func @transform_3(%arg0: i32) -> (i32, i32) {
    %c0_i32 = arith.constant 0 : i32
    %c0_i32_0 = arith.constant 0 : i32
    return %arg0, %c0_i32 : i32, i32
  }
  func.func @transform_4(%arg0: i32) -> (i32, i32, i32) {
    %c0_i32 = arith.constant 0 : i32
    %c0_i32_0 = arith.constant 0 : i32
    %c0_i32_1 = arith.constant 0 : i32
    return %arg0, %c0_i32, %c0_i32_0 : i32, i32, i32
  }
  func.func @transform_5(%arg0: i32) -> (i32, i32) {
    %c0_i32 = arith.constant 0 : i32
    %c0_i32_0 = arith.constant 0 : i32
    return %arg0, %c0_i32 : i32, i32
  }
  func.func @transform_6(%arg0: i32) -> (i32, i32, i32) {
    %c0_i32 = arith.constant 0 : i32
    %c0_i32_0 = arith.constant 0 : i32
    %c0_i32_1 = arith.constant 0 : i32
    return %arg0, %c0_i32, %c0_i32_0 : i32, i32, i32
  }
}

module attributes {stable_mosaic.version = 11 : i64} {
  func.func @_bn_act_kernel(%arg0: i32, %arg1: memref<128x8xbf16, #tpu.memory_space<vmem>>, %arg2: memref<2x8xf32, #tpu.memory_space<vmem>>, %arg3: memref<128x8xbf16, #tpu.memory_space<vmem>>) attributes {dimension_semantics = [#tpu.dimension_semantics<parallel>], iteration_bounds = array<i64: 1>, scalar_prefetch = 0 : i64, scratch_operands = 0 : i64, tpu.core_type = #tpu.core_type<tc>, window_params = [{transform_indices = @transform_0, window_bounds = array<i64: 128, 8>}, {pipeline_mode = #tpu.pipeline_mode<synchronous>, transform_indices = @transform_1, window_bounds = array<i64: 2, 8>}, {transform_indices = @transform_2, window_bounds = array<i64: 128, 8>}]} {
    %c0 = arith.constant 0 : index
    %c0_0 = arith.constant 0 : index
    %0 = vector.load %arg2[%c0, %c0_0] : memref<2x8xf32, #tpu.memory_space<vmem>>, vector<2x8xf32>
    %c0_1 = arith.constant 0 : index
    %c0_2 = arith.constant 0 : index
    %1 = vector.load %arg1[%c0_1, %c0_2] : memref<128x8xbf16, #tpu.memory_space<vmem>>, vector<128x8xbf16>
    %2 = arith.extf %1 : vector<128x8xbf16> to vector<128x8xf32>
    %3 = vector.extract_strided_slice %0 {offsets = [0, 0], sizes = [1, 8], strides = [1, 1]} : vector<2x8xf32> to vector<1x8xf32>
    %4 = vector.broadcast %3 : vector<1x8xf32> to vector<128x8xf32>
    %5 = arith.mulf %2, %4 : vector<128x8xf32>
    %6 = vector.extract_strided_slice %0 {offsets = [1, 0], sizes = [1, 8], strides = [1, 1]} : vector<2x8xf32> to vector<1x8xf32>
    %7 = vector.broadcast %6 : vector<1x8xf32> to vector<128x8xf32>
    %8 = arith.addf %5, %7 : vector<128x8xf32>
    %cst = arith.constant 0.000000e+00 : f32
    %9 = vector.broadcast %cst : f32 to vector<128x8xf32>
    %10 = arith.maximumf %8, %9 : vector<128x8xf32>
    %11 = arith.truncf %10 : vector<128x8xf32> to vector<128x8xbf16>
    %c0_3 = arith.constant 0 : index
    %c0_4 = arith.constant 0 : index
    %12 = vector.load %arg3[%c0_3, %c0_4] : memref<128x8xbf16, #tpu.memory_space<vmem>>, vector<128x8xbf16>
    tpu.vector_store %arg3[%c0_3, %c0_4], %11 {strides = array<i32>} : memref<128x8xbf16, #tpu.memory_space<vmem>>, vector<128x8xbf16>,
    return
  }
  func.func @transform_0(%arg0: i32) -> (i32, i32) {
    %c0_i32 = arith.constant 0 : i32
    %c0_i32_0 = arith.constant 0 : i32
    return %arg0, %c0_i32 : i32, i32
  }
  func.func @transform_1(%arg0: i32) -> (i32, i32) {
    %c0_i32 = arith.constant 0 : i32
    %c0_i32_0 = arith.constant 0 : i32
    %c0_i32_1 = arith.constant 0 : i32
    return %c0_i32, %c0_i32_0 : i32, i32
  }
  func.func @transform_2(%arg0: i32) -> (i32, i32) {
    %c0_i32 = arith.constant 0 : i32
    %c0_i32_0 = arith.constant 0 : i32
    return %arg0, %c0_i32 : i32, i32
  }
}

module attributes {stable_mosaic.version = 11 : i64} {
  func.func @_mm_stats_kernel(%arg0: i32, %arg1: memref<128x72xbf16, #tpu.memory_space<vmem>>, %arg2: memref<72x8xbf16, #tpu.memory_space<vmem>>, %arg3: memref<128x8xbf16, #tpu.memory_space<vmem>>, %arg4: memref<1x2x8xf32, #tpu.memory_space<vmem>>) attributes {dimension_semantics = [#tpu.dimension_semantics<parallel>], iteration_bounds = array<i64: 1>, scalar_prefetch = 0 : i64, scratch_operands = 0 : i64, tpu.core_type = #tpu.core_type<tc>, window_params = [{transform_indices = @transform_0, window_bounds = array<i64: 128, 72>}, {pipeline_mode = #tpu.pipeline_mode<synchronous>, transform_indices = @transform_1, window_bounds = array<i64: 72, 8>}, {transform_indices = @transform_2, window_bounds = array<i64: 128, 8>}, {transform_indices = @transform_3, window_bounds = array<i64: 1, 2, 8>}]} {
    %c0 = arith.constant 0 : index
    %c0_0 = arith.constant 0 : index
    %0 = vector.load %arg1[%c0, %c0_0] : memref<128x72xbf16, #tpu.memory_space<vmem>>, vector<128x72xbf16>
    %c0_1 = arith.constant 0 : index
    %c0_2 = arith.constant 0 : index
    %1 = vector.load %arg2[%c0_1, %c0_2] : memref<72x8xbf16, #tpu.memory_space<vmem>>, vector<72x8xbf16>
    %cst = arith.constant dense<0.000000e+00> : vector<128x8xf32>
    %2 = tpu.matmul %0, %1, %cst {dimension_numbers = #tpu.dot_dimension_numbers<[1], [0], [0], [1], [0, 0, 1, 1], [], []>} : vector<128x72xbf16>, vector<72x8xbf16>, vector<128x8xf32> -> vector<128x8xf32>
    %3 = arith.truncf %2 : vector<128x8xf32> to vector<128x8xbf16>
    %c0_3 = arith.constant 0 : index
    %c0_4 = arith.constant 0 : index
    %4 = vector.load %arg3[%c0_3, %c0_4] : memref<128x8xbf16, #tpu.memory_space<vmem>>, vector<128x8xbf16>
    tpu.vector_store %arg3[%c0_3, %c0_4], %3 {strides = array<i32>} : memref<128x8xbf16, #tpu.memory_space<vmem>>, vector<128x8xbf16>,
    %cst_5 = arith.constant dense<0.000000e+00> : vector<8xf32>
    %5 = vector.multi_reduction <add>, %2, %cst_5 [0] : vector<128x8xf32> to vector<8xf32>
    %6 = vector.shape_cast %5 : vector<8xf32> to vector<1x8xf32>
    %c0_6 = arith.constant 0 : index
    %c0_7 = arith.constant 0 : index
    %c0_8 = arith.constant 0 : index
    %7 = vector.load %arg4[%c0_6, %c0_7, %c0_8] : memref<1x2x8xf32, #tpu.memory_space<vmem>>, vector<1x1x8xf32>
    %8 = vector.shape_cast %7 : vector<1x1x8xf32> to vector<1x8xf32>
    %9 = vector.shape_cast %6 : vector<1x8xf32> to vector<1x1x8xf32>
    tpu.vector_store %arg4[%c0_6, %c0_7, %c0_8], %9 {strides = array<i32>} : memref<1x2x8xf32, #tpu.memory_space<vmem>>, vector<1x1x8xf32>,
    %10 = arith.mulf %2, %2 : vector<128x8xf32>
    %cst_9 = arith.constant dense<0.000000e+00> : vector<8xf32>
    %11 = vector.multi_reduction <add>, %10, %cst_9 [0] : vector<128x8xf32> to vector<8xf32>
    %12 = vector.shape_cast %11 : vector<8xf32> to vector<1x8xf32>
    %c0_10 = arith.constant 0 : index
    %c1 = arith.constant 1 : index
    %c0_11 = arith.constant 0 : index
    %13 = vector.load %arg4[%c0_10, %c1, %c0_11] : memref<1x2x8xf32, #tpu.memory_space<vmem>>, vector<1x1x8xf32>
    %14 = vector.shape_cast %13 : vector<1x1x8xf32> to vector<1x8xf32>
    %15 = vector.shape_cast %12 : vector<1x8xf32> to vector<1x1x8xf32>
    tpu.vector_store %arg4[%c0_10, %c1, %c0_11], %15 {strides = array<i32>} : memref<1x2x8xf32, #tpu.memory_space<vmem>>, vector<1x1x8xf32>,
    return
  }
  func.func @transform_0(%arg0: i32) -> (i32, i32) {
    %c0_i32 = arith.constant 0 : i32
    %c0_i32_0 = arith.constant 0 : i32
    return %arg0, %c0_i32 : i32, i32
  }
  func.func @transform_1(%arg0: i32) -> (i32, i32) {
    %c0_i32 = arith.constant 0 : i32
    %c0_i32_0 = arith.constant 0 : i32
    %c0_i32_1 = arith.constant 0 : i32
    return %c0_i32, %c0_i32_0 : i32, i32
  }
  func.func @transform_2(%arg0: i32) -> (i32, i32) {
    %c0_i32 = arith.constant 0 : i32
    %c0_i32_0 = arith.constant 0 : i32
    return %arg0, %c0_i32 : i32, i32
  }
  func.func @transform_3(%arg0: i32) -> (i32, i32, i32) {
    %c0_i32 = arith.constant 0 : i32
    %c0_i32_0 = arith.constant 0 : i32
    %c0_i32_1 = arith.constant 0 : i32
    return %arg0, %c0_i32, %c0_i32_0 : i32, i32, i32
  }
}

module attributes {stable_mosaic.version = 11 : i64} {
  func.func @_bn_add_bn_act_kernel(%arg0: i32, %arg1: memref<128x8xbf16, #tpu.memory_space<vmem>>, %arg2: memref<2x8xf32, #tpu.memory_space<vmem>>, %arg3: memref<128x8xbf16, #tpu.memory_space<vmem>>, %arg4: memref<2x8xf32, #tpu.memory_space<vmem>>, %arg5: memref<128x8xf32, #tpu.memory_space<vmem>>) attributes {dimension_semantics = [#tpu.dimension_semantics<parallel>], iteration_bounds = array<i64: 1>, scalar_prefetch = 0 : i64, scratch_operands = 0 : i64, tpu.core_type = #tpu.core_type<tc>, window_params = [{transform_indices = @transform_0, window_bounds = array<i64: 128, 8>}, {pipeline_mode = #tpu.pipeline_mode<synchronous>, transform_indices = @transform_1, window_bounds = array<i64: 2, 8>}, {transform_indices = @transform_2, window_bounds = array<i64: 128, 8>}, {pipeline_mode = #tpu.pipeline_mode<synchronous>, transform_indices = @transform_3, window_bounds = array<i64: 2, 8>}, {transform_indices = @transform_4, window_bounds = array<i64: 128, 8>}]} {
    %c0 = arith.constant 0 : index
    %c0_0 = arith.constant 0 : index
    %0 = vector.load %arg2[%c0, %c0_0] : memref<2x8xf32, #tpu.memory_space<vmem>>, vector<2x8xf32>
    %c0_1 = arith.constant 0 : index
    %c0_2 = arith.constant 0 : index
    %1 = vector.load %arg4[%c0_1, %c0_2] : memref<2x8xf32, #tpu.memory_space<vmem>>, vector<2x8xf32>
    %c0_3 = arith.constant 0 : index
    %c0_4 = arith.constant 0 : index
    %2 = vector.load %arg1[%c0_3, %c0_4] : memref<128x8xbf16, #tpu.memory_space<vmem>>, vector<128x8xbf16>
    %3 = arith.extf %2 : vector<128x8xbf16> to vector<128x8xf32>
    %4 = vector.extract_strided_slice %0 {offsets = [0, 0], sizes = [1, 8], strides = [1, 1]} : vector<2x8xf32> to vector<1x8xf32>
    %5 = vector.broadcast %4 : vector<1x8xf32> to vector<128x8xf32>
    %6 = arith.mulf %3, %5 : vector<128x8xf32>
    %7 = vector.extract_strided_slice %0 {offsets = [1, 0], sizes = [1, 8], strides = [1, 1]} : vector<2x8xf32> to vector<1x8xf32>
    %8 = vector.broadcast %7 : vector<1x8xf32> to vector<128x8xf32>
    %9 = arith.addf %6, %8 : vector<128x8xf32>
    %c0_5 = arith.constant 0 : index
    %c0_6 = arith.constant 0 : index
    %10 = vector.load %arg3[%c0_5, %c0_6] : memref<128x8xbf16, #tpu.memory_space<vmem>>, vector<128x8xbf16>
    %11 = arith.extf %10 : vector<128x8xbf16> to vector<128x8xf32>
    %12 = vector.extract_strided_slice %1 {offsets = [0, 0], sizes = [1, 8], strides = [1, 1]} : vector<2x8xf32> to vector<1x8xf32>
    %13 = vector.broadcast %12 : vector<1x8xf32> to vector<128x8xf32>
    %14 = arith.mulf %11, %13 : vector<128x8xf32>
    %15 = arith.addf %9, %14 : vector<128x8xf32>
    %16 = vector.extract_strided_slice %1 {offsets = [1, 0], sizes = [1, 8], strides = [1, 1]} : vector<2x8xf32> to vector<1x8xf32>
    %17 = vector.broadcast %16 : vector<1x8xf32> to vector<128x8xf32>
    %18 = arith.addf %15, %17 : vector<128x8xf32>
    %cst = arith.constant 0.000000e+00 : f32
    %19 = vector.broadcast %cst : f32 to vector<128x8xf32>
    %20 = arith.maximumf %18, %19 : vector<128x8xf32>
    %c0_7 = arith.constant 0 : index
    %c0_8 = arith.constant 0 : index
    %21 = vector.load %arg5[%c0_7, %c0_8] : memref<128x8xf32, #tpu.memory_space<vmem>>, vector<128x8xf32>
    tpu.vector_store %arg5[%c0_7, %c0_8], %20 {strides = array<i32>} : memref<128x8xf32, #tpu.memory_space<vmem>>, vector<128x8xf32>,
    return
  }
  func.func @transform_0(%arg0: i32) -> (i32, i32) {
    %c0_i32 = arith.constant 0 : i32
    %c0_i32_0 = arith.constant 0 : i32
    return %arg0, %c0_i32 : i32, i32
  }
  func.func @transform_1(%arg0: i32) -> (i32, i32) {
    %c0_i32 = arith.constant 0 : i32
    %c0_i32_0 = arith.constant 0 : i32
    %c0_i32_1 = arith.constant 0 : i32
    return %c0_i32, %c0_i32_0 : i32, i32
  }
  func.func @transform_2(%arg0: i32) -> (i32, i32) {
    %c0_i32 = arith.constant 0 : i32
    %c0_i32_0 = arith.constant 0 : i32
    return %arg0, %c0_i32 : i32, i32
  }
  func.func @transform_3(%arg0: i32) -> (i32, i32) {
    %c0_i32 = arith.constant 0 : i32
    %c0_i32_0 = arith.constant 0 : i32
    %c0_i32_1 = arith.constant 0 : i32
    return %c0_i32, %c0_i32_0 : i32, i32
  }
  func.func @transform_4(%arg0: i32) -> (i32, i32) {
    %c0_i32 = arith.constant 0 : i32
    %c0_i32_0 = arith.constant 0 : i32
    return %arg0, %c0_i32 : i32, i32
  }
}

</mosaic_0001>

<bundles_post_ra>
// kernel: resnet18_sub_forward.5
= control target key start
LH: loop header
LB: loop body
LE: loop exit
PB: predicated region body
PF: predicated region fallthrough
CT: control target
= control target key end

     0   :  { %vm110_vm0 = vcmask 60416   ;;  %s312_s0 = inlined_call_operand.vmem [shape: bf16[128,8], index: 0, kind: input, shape index: {}]   ;;  %s313_s1 = inlined_call_operand.vmem [shape: f32[2,8], index: 1, kind: input, shape index: {}]   ;;  %s314_s2 = inlined_call_operand.vmem [shape: bf16[128,8], index: 2, kind: output, shape index: {}]  }
   0x1   :  { %v11_v0 = vld [vmem:[%s313_s1] sm:$0x3]  ;;  %v163_v2 = vld [vmem:[%s312_s0 + $0x8] sm:$0xff]   ;;  %v164_v7 = vld [vmem:[%s312_s0 + $0x10] sm:$0xff]  }
   0x2   :  { %v132_v1 = vld [vmem:[%s312_s0] sm:$0xff]   ;;  %v194_v4 = vperm.slane %v11_v0, 0  ;;  %v196_v5 = vperm.slane %v11_v0, 1  ;;  %v165_v8 = vld [vmem:[%s312_s0 + $0x18] sm:$0xff]   ;;  %v137_v9 = vunpack.c.l.bf16 %v163_v2  ;;  %v138_v10 = vunpack.c.h.bf16 %v163_v2  ;;  %v167_v42 = vld [vmem:[%s312_s0 + $0x28] sm:$0xff]  }
   0x3   :  { %v133_v3 = vunpack.c.l.bf16 %v132_v1  ;;  %v134_v6 = vunpack.c.h.bf16 %v132_v1  ;;  %v141_v11 = vunpack.c.l.bf16 %v164_v7  ;;  %v142_v12 = vunpack.c.h.bf16 %v164_v7  ;;  %v166_v37 = vld [vmem:[%s312_s0 + $0x20] sm:$0xff]   ;;  %v168_v43 = vld [vmem:[%s312_s0 + $0x30] sm:$0xff]   ;;  %v169_v48 = vld [vmem:[%s312_s0 + $0x38] sm:$0xff]  }
   0x4   :  { %v145_v15 = vunpack.c.l.bf16 %v165_v8  ;;  %v146_v16 = vunpack.c.h.bf16 %v165_v8  ;;  %v47_v17 = vmul.f32 %v137_v9, %v194_v4  ;;  %v48_v18 = vmul.f32 %v138_v10, %v194_v4 }
   0x5   :  { %v45_v13 = vmul.f32 %v133_v3, %v194_v4  ;;  %v46_v14 = vmul.f32 %v134_v6, %v194_v4  ;;  %v49_v19 = vmul.f32 %v141_v11, %v194_v4  ;;  %v50_v20 = vmul.f32 %v142_v12, %v194_v4 }
   0x6   :  { %v51_v23 = vmul.f32 %v145_v15, %v194_v4  ;;  %v52_v24 = vmul.f32 %v146_v16, %v194_v4  ;;  %v64_v25 = vadd.f32 %v196_v5, %v47_v17  ;;  %v65_v26 = vadd.f32 %v196_v5, %v48_v18 }
   0x7   :  { %v62_v21 = vadd.f32 %v196_v5, %v45_v13  ;;  %v63_v22 = vadd.f32 %v196_v5, %v46_v14  ;;  %v66_v27 = vadd.f32 %v196_v5, %v49_v19  ;;  %v67_v28 = vadd.f32 %v196_v5, %v50_v20 }
   0x8   :  { %v68_v31 = vadd.f32 %v196_v5, %v51_v23  ;;  %v69_v32 = vadd.f32 %v196_v5, %v52_v24  ;;  %v80_v33 = vmax.f32 %v64_v25, 0.0  ;;  %v81_v34 = vmax.f32 %v65_v26, 0.0 }
   0x9   :  { %v78_v29 = vmax.f32 %v62_v21, 0.0  ;;  %v79_v30 = vmax.f32 %v63_v22, 0.0  ;;  %v82_v35 = vmax.f32 %v66_v27, 0.0  ;;  %v83_v36 = vmax.f32 %v67_v28, 0.0 }
   0xa   :  { %v84_v40 = vmax.f32 %v68_v31, 0.0  ;;  %v85_v41 = vmax.f32 %v69_v32, 0.0  ;;  %v96_v44 = vpack.c.bf16 %v80_v33, %v80_v33  ;;  %v97_v45 = vpack.c.bf16 %v81_v34, %v81_v34 }
   0xb   :  { %v94_v38 = vpack.c.bf16 %v78_v29, %v78_v29  ;;  %v95_v39 = vpack.c.bf16 %v79_v30, %v79_v30  ;;  %v98_v46 = vpack.c.bf16 %v82_v35, %v82_v35  ;;  %v99_v47 = vpack.c.bf16 %v83_v36, %v83_v36 }
   0xc   :  { %v100_v49 = vpack.c.bf16 %v84_v40, %v84_v40  ;;  %v101_v50 = vpack.c.bf16 %v85_v41, %v85_v41  ;;  %v149_v51 = vunpack.c.l.bf16 %v166_v37  ;;  %v150_v52 = vunpack.c.h.bf16 %v166_v37  ;;  %113 = vst.msk [vmem:[%s314_s2 + $0x8] sm:$0xf] %vm110_vm0, %v96_v44 }
   0xd   :  { %111 = vst.msk [vmem:[%s314_s2] sm:$0xf] %vm110_vm0, %v94_v38  ;;  %v153_v53 = vunpack.c.l.bf16 %v167_v42  ;;  %v154_v54 = vunpack.c.h.bf16 %v167_v42  ;;  %v157_v55 = vunpack.c.l.bf16 %v168_v43  ;;  %v158_v56 = vunpack.c.h.bf16 %v168_v43 }
   0xe   :  { %112 = vst.msk [vmem:[%s314_s2 + $0x4] sm:$0xf] %vm110_vm0, %v95_v39  ;;  %v53_v57 = vmul.f32 %v149_v51, %v194_v4  ;;  %v54_v58 = vmul.f32 %v150_v52, %v194_v4  ;;  %v161_v59 = vunpack.c.l.bf16 %v169_v48  ;;  %v162_v60 = vunpack.c.h.bf16 %v169_v48 }
   0xf   :  { %114 = vst.msk [vmem:[%s314_s2 + $0xc] sm:$0xf] %vm110_vm0, %v97_v45  ;;  %v55_v61 = vmul.f32 %v153_v53, %v194_v4  ;;  %v56_v62 = vmul.f32 %v154_v54, %v194_v4  ;;  %v57_v63 = vmul.f32 %v157_v55, %v194_v4  ;;  %v58_v0 = vmul.f32 %v158_v56, %v194_v4 }
  0x10   :  { %115 = vst.msk [vmem:[%s314_s2 + $0x10] sm:$0xf] %vm110_vm0, %v98_v46  ;;  %v70_v1 = vadd.f32 %v196_v5, %v53_v57  ;;  %v71_v2 = vadd.f32 %v196_v5, %v54_v58  ;;  %v59_v3 = vmul.f32 %v161_v59, %v194_v4  ;;  %v60_v6 = vmul.f32 %v162_v60, %v194_v4 }
  0x11   :  { %116 = vst.msk [vmem:[%s314_s2 + $0x14] sm:$0xf] %vm110_vm0, %v99_v47  ;;  %v72_v7 = vadd.f32 %v196_v5, %v55_v61  ;;  %v73_v8 = vadd.f32 %v196_v5, %v56_v62  ;;  %v74_v9 = vadd.f32 %v196_v5, %v57_v63  ;;  %v75_v10 = vadd.f32 %v196_v5, %v58_v0 }
  0x12   :  { %117 = vst.msk [vmem:[%s314_s2 + $0x18] sm:$0xf] %vm110_vm0, %v100_v49  ;;  %v86_v11 = vmax.f32 %v70_v1, 0.0  ;;  %v87_v4 = vmax.f32 %v71_v2, 0.0  ;;  %v76_v12 = vadd.f32 %v196_v5, %v59_v3  ;;  %v77_v13 = vadd.f32 %v196_v5, %v60_v6 }
  0x13   :  { %118 = vst.msk [vmem:[%s314_s2 + $0x1c] sm:$0xf] %vm110_vm0, %v101_v50  ;;  %v88_v14 = vmax.f32 %v72_v7, 0.0  ;;  %v89_v15 = vmax.f32 %v73_v8, 0.0  ;;  %v90_v16 = vmax.f32 %v74_v9, 0.0  ;;  %v91_v17 = vmax.f32 %v75_v10, 0.0 }
  0x14   :  { %v102_v18 = vpack.c.bf16 %v86_v11, %v86_v11  ;;  %v103_v19 = vpack.c.bf16 %v87_v4, %v87_v4  ;;  %v92_v20 = vmax.f32 %v76_v12, 0.0  ;;  %v93_v23 = vmax.f32 %v77_v13, 0.0 }
  0x15   :  { %v104_v21 = vpack.c.bf16 %v88_v14, %v88_v14  ;;  %v105_v22 = vpack.c.bf16 %v89_v15, %v89_v15  ;;  %v106_v5 = vpack.c.bf16 %v90_v16, %v90_v16  ;;  %v107_v24 = vpack.c.bf16 %v91_v17, %v91_v17 }
  0x16   :  { %119 = vst.msk [vmem:[%s314_s2 + $0x20] sm:$0xf] %vm110_vm0, %v102_v18  ;;  %v108_v25 = vpack.c.bf16 %v92_v20, %v92_v20  ;;  %v109_v26 = vpack.c.bf16 %v93_v23, %v93_v23 }
  0x17   :  { %120 = vst.msk [vmem:[%s314_s2 + $0x24] sm:$0xf] %vm110_vm0, %v103_v19 }
  0x18   :  { %121 = vst.msk [vmem:[%s314_s2 + $0x28] sm:$0xf] %vm110_vm0, %v104_v21 }
  0x19   :  { %122 = vst.msk [vmem:[%s314_s2 + $0x2c] sm:$0xf] %vm110_vm0, %v105_v22 }
  0x1a   :  { %123 = vst.msk [vmem:[%s314_s2 + $0x30] sm:$0xf] %vm110_vm0, %v106_v5 }
  0x1b   :  { %124 = vst.msk [vmem:[%s314_s2 + $0x34] sm:$0xf] %vm110_vm0, %v107_v24 }
  0x1c   :  { %125 = vst.msk [vmem:[%s314_s2 + $0x38] sm:$0xf] %vm110_vm0, %v108_v25 }
  0x1d   :  { %126 = vst.msk [vmem:[%s314_s2 + $0x3c] sm:$0xf] %vm110_vm0, %v109_v26 }

// kernel: resnet18_sub_forward.4
= control target key start
LH: loop header
LB: loop body
LE: loop exit
PB: predicated region body
PF: predicated region fallthrough
CT: control target
= control target key end

     0   :  { %vm120_vm0 = vcmask 1041408   ;;  %vm301_vm1 = vcmask 31744   ;;  %vm95_vm2 = vcmask 293888   ;;  %vm189_vm3 = vcmask 60416   ;;  %s1069_s2 = inlined_call_operand.vmem [shape: bf16[4,8], index: 2, kind: input, shape index: {}]   ;;  %s1070_s0 = inlined_call_operand.vmem [shape: bf16[128,36], index: 0, kind: input, shape index: {}]   ;;  %s1071_s1 = inlined_call_operand.vmem [shape: bf16[36,8], index: 1, kind: input, shape index: {}]   ;;  %s1072_s5 = inlined_call_operand.vmem [shape: bf16[128,8], index: 5, kind: output, shape index: {2}]   ;;  %s1073_s3 = inlined_call_operand.vmem [shape: bf16[128,8], index: 3, kind: output, shape index: {0}]   ;;  %s1074_s4 = inlined_call_operand.vmem [shape: f32[1,2,8], index: 4, kind: output, shape index: {1}]   ;;  %s1075_s6 = inlined_call_operand.vmem [shape: f32[1,2,8], index: 6, kind: output, shape index: {3}]  }
   0x1   :  { %v300_v0 = vld [vmem:[%s1069_s2] sm:$0x3]  ;;  %v39_v1 = vld [vmem:[%s1071_s1 + $0x10] sm:$0x3]  ;;  %v571_v5 = vld [vmem:[%s1070_s0 + $0x28] sm:$0xff]  ;;  %vm206_vm4 = vcmask 64512  }
   0x2   :  { %v319_v2 = vsel %vm120_vm0, %v300_v0, 0  ;;  %v566_v3 = vld [vmem:[%s1070_s0] sm:$0xff]  ;;  %v89_v4 = vunpack.c.l.b16 %v39_v1  ;;  %v575_v8 = vld [vmem:[%s1071_s1 + $0x8] sm:$0xff]  ;;  %v572_v12 = vld [vmem:[%s1070_s0 + $0x30] sm:$0xff]  ;;  %vm244_vm5 = vcmask 57344  }
   0x3   :  { %328 = vmatpush.bf16.msra.mxu1 %v319_v2  ;;  %579 = vmatpush.bf16.msra.mxu3 %v319_v2  ;;  %v574_v9 = vld [vmem:[%s1071_s1] sm:$0xff]  ;;  %v567_v11 = vld [vmem:[%s1070_s0 + $0x8] sm:$0xff]  ;;  %v568_v13 = vld [vmem:[%s1070_s0 + $0x10] sm:$0xff] }
   0x4   :  { %v92_v6 = vpack.c.b16 %v89_v4, %v89_v4  ;;  %v570_v10 = vld [vmem:[%s1070_s0 + $0x20] sm:$0xff]  ;;  %v573_v14 = vld [vmem:[%s1070_s0 + $0x38] sm:$0xff] }
   0x5   :  { %v569_v15 = vld [vmem:[%s1070_s0 + $0x18] sm:$0xff] }
   0x6   :  { %558 = vmatmul.msk.bf16.vlgmr.msra.gmra.mxu1 %vm301_vm1, %v566_v3  ;;  %v122_v7 = vsel %vm120_vm0, %v92_v6, 0  ;;  %563 = vmatmul.msk.bf16.vlgmr.msra.gmra.mxu3 %vm301_vm1, %v571_v5 }
   0x7   :  { %129 = vmatpush.bf16.msra.mxu0 %v122_v7  ;;  %576 = vmatpush.bf16.msra.mxu2 %v122_v7 }
   0xb   :  { %130 = vmatpush.bf16.msra.mxu0 %v575_v8  ;;  %577 = vmatpush.bf16.msra.mxu2 %v575_v8 }
   0xf   :  { %131 = vmatpush.bf16.msra.mxu0 %v574_v9  ;;  %578 = vmatpush.bf16.msra.mxu2 %v574_v9 }
  0x12   :  { %550 = vmatmul.msk.bf16.vlgmr.msra.gmra.mxu0 %vm95_vm2, %v566_v3  ;;  %554 = vmatmul.msk.bf16.vlgmr.msra.gmra.mxu2 %vm95_vm2, %v570_v10 }
  0x16   :  { %559 = vmatmul.msk.bf16.gmra.mxu1 %vm301_vm1, %v567_v11  ;;  %564 = vmatmul.msk.bf16.gmra.mxu3 %vm301_vm1, %v572_v12 }
  0x22   :  { %551 = vmatmul.msk.bf16.gmra.mxu0 %vm95_vm2, %v567_v11  ;;  %555 = vmatmul.msk.bf16.gmra.mxu2 %vm95_vm2, %v571_v5 }
  0x26   :  { %560 = vmatmul.msk.bf16.gmra.mxu1 %vm301_vm1, %v568_v13  ;;  %565 = vmatmul.msk.bf16.gmra.mxu3 %vm301_vm1, %v573_v14 }
  0x32   :  { %552 = vmatmul.msk.bf16.gmra.mxu0 %vm95_vm2, %v568_v13  ;;  %556 = vmatmul.msk.bf16.gmra.mxu2 %vm95_vm2, %v572_v12 }
  0x36   :  { %561 = vmatmul.msk.bf16.gmra.mxu1 %vm301_vm1, %v569_v15 }
  0x42   :  { %553 = vmatmul.msk.bf16.gmra.mxu0 %vm95_vm2, %v569_v15  ;;  %557 = vmatmul.msk.bf16.gmra.mxu2 %vm95_vm2, %v573_v14 }
  0x46   :  { %562 = vmatmul.msk.bf16.gmra.mxu1 %vm301_vm1, %v570_v10 }
  0x83   :  { %v667_v16 = vpop.f32.mrf.mxu1 }
  0x84   :  { %v370_v17 = vpack.c.bf16 %v667_v16, %v667_v16  ;;  %v440_v54 = vmul.f32 %v667_v16, %v667_v16  ;;  %v402_v1 = vsel %vm206_vm4, %v667_v16, 0.0 }
  0x86   :  { %386 = vst.msk [vmem:[%s1072_s5] sm:$0xf] %vm189_vm3, %v370_v17  ;;  %v456_v2 = vsel %vm206_vm4, %v440_v54, 0.0 }
  0x89   :  { %v675_v18 = vpop.f32.mrf.mxu3 }
  0x8a   :  { %v380_v20 = vpack.c.bf16 %v675_v18, %v675_v18  ;;  %v450_v56 = vmul.f32 %v675_v18, %v675_v18  ;;  %v848_v7 = vsel %vm206_vm4, %v675_v18, 0.0 }
  0x8b   :  { %v332_v19 = vpop.f32.mrf.mxu1 }
  0x8c   :  { %v371_v21 = vpack.c.bf16 %v332_v19, %v332_v19  ;;  %396 = vst.msk [vmem:[%s1072_s5 + $0x28] sm:$0xf] %vm189_vm3, %v380_v20  ;;  %v441_v52 = vmul.f32 %v332_v19, %v332_v19  ;;  %v403_v58 = vsel %vm206_vm4, %v332_v19, 0.0  ;;  %v851_v8 = vsel %vm206_vm4, %v450_v56, 0.0 }
  0x8d   :  { %v404_v6 = vadd.f32 %v403_v58, %v402_v1 }
  0x8e   :  { %387 = vst.msk [vmem:[%s1072_s5 + $0x4] sm:$0xf] %vm189_vm3, %v371_v21  ;;  %v457_v62 = vsel %vm206_vm4, %v441_v52, 0.0 }
  0x8f   :  { %v687_v22 = vpop.f32.mrf.mxu0  ;;  %v458_v10 = vadd.f32 %v457_v62, %v456_v2 }
  0x90   :  { %v173_v23 = vpack.c.bf16 %v687_v22, %v687_v22  ;;  %v246_v59 = vmul.f32 %v687_v22, %v687_v22  ;;  %v207_v11 = vsel %vm206_vm4, %v687_v22, 0.0 }
  0x91   :  { %v691_v24 = vpop.f32.mrf.mxu3 }
  0x92   :  { %190 = vst.msk [vmem:[%s1073_s3] sm:$0xf] %vm189_vm3, %v173_v23  ;;  %v381_v25 = vpack.c.bf16 %v691_v24, %v691_v24  ;;  %v451_v4 = vmul.f32 %v691_v24, %v691_v24  ;;  %v262_v12 = vsel %vm206_vm4, %v246_v59, 0.0  ;;  %v882_v21 = vsel %vm206_vm4, %v691_v24, 0.0 }
  0x93   :  { %v699_v26 = vpop.f32.mrf.mxu1 }
  0x94   :  { %v372_v27 = vpack.c.bf16 %v699_v26, %v699_v26  ;;  %397 = vst.msk [vmem:[%s1072_s5 + $0x2c] sm:$0xf] %vm189_vm3, %v381_v25  ;;  %v442_v63 = vmul.f32 %v699_v26, %v699_v26  ;;  %v405_v13 = vsel %vm206_vm4, %v699_v26, 0.0  ;;  %v885_v22 = vsel %vm206_vm4, %v451_v4, 0.0 }
  0x95   :  { %v707_v28 = vpop.f32.mrf.mxu2 }
  0x96   :  { %388 = vst.msk [vmem:[%s1072_s5 + $0x8] sm:$0xf] %vm189_vm3, %v372_v27  ;;  %v181_v29 = vpack.c.bf16 %v707_v28, %v707_v28  ;;  %v459_v15 = vsel %vm206_vm4, %v442_v63, 0.0  ;;  %v254_v16 = vmul.f32 %v707_v28, %v707_v28 }
  0x97   :  { %v715_v30 = vpop.f32.mrf.mxu0 }
  0x98   :  { %v174_v31 = vpack.c.bf16 %v715_v30, %v715_v30  ;;  %198 = vst.msk [vmem:[%s1073_s3 + $0x20] sm:$0xf] %vm189_vm3, %v181_v29  ;;  %v247_v3 = vmul.f32 %v715_v30, %v715_v30  ;;  %v208_v19 = vsel %vm206_vm4, %v715_v30, 0.0  ;;  %v406_v29 = vadd.f32 %v405_v13, %v404_v6 }
  0x99   :  { %v723_v32 = vpop.f32.mrf.mxu3  ;;  %v460_v30 = vadd.f32 %v459_v15, %v458_v10 }
  0x9a   :  { %191 = vst.msk [vmem:[%s1073_s3 + $0x4] sm:$0xf] %vm189_vm3, %v174_v31  ;;  %v382_v34 = vpack.c.bf16 %v723_v32, %v723_v32  ;;  %v263_v20 = vsel %vm206_vm4, %v247_v3, 0.0  ;;  %v452_v24 = vmul.f32 %v723_v32, %v723_v32  ;;  %v899_v31 = vsel %vm206_vm4, %v707_v28, 0.0 }
  0x9b   :  { %v729_v33 = vpop.f32.mrf.mxu1 }
  0x9c   :  { %v373_v35 = vpack.c.bf16 %v729_v33, %v729_v33  ;;  %398 = vst.msk [vmem:[%s1072_s5 + $0x30] sm:$0xf] %vm189_vm3, %v382_v34  ;;  %v443_v17 = vmul.f32 %v729_v33, %v729_v33  ;;  %v407_v25 = vsel %vm206_vm4, %v729_v33, 0.0  ;;  %v209_v34 = vadd.f32 %v208_v19, %v207_v11 }
  0x9d   :  { %v735_v36 = vpop.f32.mrf.mxu2 }
  0x9e   :  { %389 = vst.msk [vmem:[%s1072_s5 + $0xc] sm:$0xf] %vm189_vm3, %v373_v35  ;;  %v182_v37 = vpack.c.bf16 %v735_v36, %v735_v36  ;;  %v264_v35 = vadd.f32 %v263_v20, %v262_v12  ;;  %v255_v28 = vmul.f32 %v735_v36, %v735_v36 }
  0x9f   :  { %v747_v38 = vpop.f32.mrf.mxu0 }
  0xa0   :  { %v175_v39 = vpack.c.bf16 %v747_v38, %v747_v38  ;;  %199 = vst.msk [vmem:[%s1073_s3 + $0x24] sm:$0xf] %vm189_vm3, %v182_v37  ;;  %v248_v26 = vmul.f32 %v747_v38, %v747_v38  ;;  %v904_v37 = vsel %vm206_vm4, %v254_v16, 0.0 }
  0xa1   :  { %v755_v40 = vpop.f32.mrf.mxu3 }
  0xa2   :  { %192 = vst.msk [vmem:[%s1073_s3 + $0x8] sm:$0xf] %vm189_vm3, %v175_v39  ;;  %v383_v41 = vpack.c.bf16 %v755_v40, %v755_v40  ;;  %v461_v39 = vsel %vm206_vm4, %v443_v17, 0.0  ;;  %v265_v52 = vsel %vm206_vm4, %v248_v26, 0.0 }
  0xa3   :  { %v763_v42 = vpop.f32.mrf.mxu1  ;;  %v462_v56 = vadd.f32 %v461_v39, %v460_v30  ;;  %v266_v63 = vadd.f32 %v265_v52, %v264_v35 }
  0xa4   :  { %v374_v43 = vpack.c.bf16 %v763_v42, %v763_v42  ;;  %399 = vst.msk [vmem:[%s1072_s5 + $0x34] sm:$0xf] %vm189_vm3, %v383_v41  ;;  %v444_v33 = vmul.f32 %v763_v42, %v763_v42  ;;  %v408_v41 = vadd.f32 %v407_v25, %v406_v29  ;;  %v409_v58 = vsel %vm206_vm4, %v763_v42, 0.0 }
  0xa5   :  { %v771_v44 = vpop.f32.mrf.mxu2 }
  0xa6   :  { %390 = vst.msk [vmem:[%s1072_s5 + $0x10] sm:$0xf] %vm189_vm3, %v374_v43  ;;  %v183_v45 = vpack.c.bf16 %v771_v44, %v771_v44 }
  0xa7   :  { %v779_v46 = vpop.f32.mrf.mxu0 }
  0xa8   :  { %v176_v47 = vpack.c.bf16 %v779_v46, %v779_v46  ;;  %200 = vst.msk [vmem:[%s1073_s3 + $0x28] sm:$0xf] %vm189_vm3, %v183_v45  ;;  %v249_v43 = vmul.f32 %v779_v46, %v779_v46  ;;  %v917_v45 = vsel %vm206_vm4, %v723_v32, 0.0  ;;  %v463_v32 = vsel %vm206_vm4, %v444_v33, 0.0 }
  0xa9   :  { %v787_v48 = vpop.f32.mrf.mxu3  ;;  %v464_v10 = vadd.f32 %v463_v32, %v462_v56 }
  0xaa   :  { %193 = vst.msk [vmem:[%s1073_s3 + $0xc] sm:$0xf] %vm189_vm3, %v176_v47  ;;  %v384_v60 = vpack.c.bf16 %v787_v48, %v787_v48 }
  0xab   :  { %v793_v49 = vpop.f32.mrf.mxu1 }
  0xac   :  { %v375_v50 = vpack.c.bf16 %v793_v49, %v793_v49  ;;  %400 = vst.msk [vmem:[%s1072_s5 + $0x38] sm:$0xf] %vm189_vm3, %v384_v60  ;;  %v445_v60 = vmul.f32 %v793_v49, %v793_v49  ;;  %v411_v2 = vsel %vm206_vm4, %v793_v49, 0.0 }
  0xad   :  { %v797_v51 = vpop.f32.mrf.mxu2 }
  0xae   :  { %391 = vst.msk [vmem:[%s1072_s5 + $0x14] sm:$0xf] %vm189_vm3, %v375_v50  ;;  %v184_v53 = vpack.c.bf16 %v797_v51, %v797_v51  ;;  %v210_v50 = vsel %vm206_vm4, %v747_v38, 0.0  ;;  %v212_v38 = vsel %vm206_vm4, %v779_v46, 0.0  ;;  %v267_v46 = vsel %vm206_vm4, %v249_v43, 0.0 }
  0xaf   :  { %v807_v55 = vpop.f32.mrf.mxu0  ;;  %v211_v42 = vadd.f32 %v210_v50, %v209_v34  ;;  %v465_v13 = vsel %vm206_vm4, %v445_v60, 0.0  ;;  %v268_v16 = vadd.f32 %v267_v46, %v266_v63  ;;  %v453_v63 = vmul.f32 %v755_v40, %v755_v40 }
  0xb0   :  { %v177_v57 = vpack.c.bf16 %v807_v55, %v807_v55  ;;  %201 = vst.msk [vmem:[%s1073_s3 + $0x2c] sm:$0xf] %vm189_vm3, %v184_v53  ;;  %v923_v53 = vsel %vm206_vm4, %v452_v24, 0.0  ;;  %v250_v62 = vmul.f32 %v807_v55, %v807_v55  ;;  %v214_v3 = vsel %vm206_vm4, %v807_v55, 0.0 }
  0xb1   :  { %v822_v61 = vpop.f32.mrf.mxu3  ;;  %v213_v11 = vadd.f32 %v212_v38, %v211_v42  ;;  %v427_v42 = vsel %vm206_vm4, %v755_v40, 0.0 }
  0xb2   :  { %194 = vst.msk [vmem:[%s1073_s3 + $0x10] sm:$0xf] %vm189_vm3, %v177_v57  ;;  %v385_v0 = vpack.c.bf16 %v822_v61, %v822_v61  ;;  %v927_v57 = vsel %vm206_vm4, %v735_v36, 0.0  ;;  %v269_v49 = vsel %vm206_vm4, %v250_v62, 0.0 }
  0xb3   :  { %v840_v5 = vpop.f32.mrf.mxu1  ;;  %v270_v29 = vadd.f32 %v269_v49, %v268_v16 }
  0xb4   :  { %v376_v9 = vpack.c.bf16 %v840_v5, %v840_v5  ;;  %401 = vst.msk [vmem:[%s1072_s5 + $0x3c] sm:$0xf] %vm189_vm3, %v385_v0  ;;  %v947_v0 = vsel %vm206_vm4, %v255_v28, 0.0  ;;  %v446_v12 = vmul.f32 %v840_v5, %v840_v5  ;;  %v413_v25 = vsel %vm206_vm4, %v840_v5, 0.0 }
  0xb5   :  { %v864_v14 = vpop.f32.mrf.mxu2 }
  0xb6   :  { %392 = vst.msk [vmem:[%s1072_s5 + $0x18] sm:$0xf] %vm189_vm3, %v376_v9  ;;  %v185_v18 = vpack.c.bf16 %v864_v14, %v864_v14  ;;  %v410_v9 = vadd.f32 %v409_v58, %v408_v41  ;;  %v467_v30 = vsel %vm206_vm4, %v446_v12, 0.0 }
  0xb7   :  { %v145_v23 = vpop.f32.mrf.mxu0 }
  0xb8   :  { %v178_v27 = vpack.c.bf16 %v145_v23, %v145_v23  ;;  %202 = vst.msk [vmem:[%s1073_s3 + $0x30] sm:$0xf] %vm189_vm3, %v185_v18  ;;  %v251_v4 = vmul.f32 %v145_v23, %v145_v23  ;;  %v216_v15 = vsel %vm206_vm4, %v145_v23, 0.0  ;;  %v412_v17 = vadd.f32 %v411_v2, %v410_v9 }
  0xb9   :  { %v215_v18 = vadd.f32 %v214_v3, %v213_v11  ;;  %v466_v23 = vadd.f32 %v465_v13, %v464_v10  ;;  %v256_v10 = vmul.f32 %v771_v44, %v771_v44 }
  0xba   :  { %195 = vst.msk [vmem:[%s1073_s3 + $0x14] sm:$0xf] %vm189_vm3, %v178_v27  ;;  %v271_v26 = vsel %vm206_vm4, %v251_v4, 0.0  ;;  %v414_v28 = vadd.f32 %v413_v25, %v412_v17  ;;  %v226_v17 = vsel %vm206_vm4, %v771_v44, 0.0  ;;  %v228_v44 = vsel %vm206_vm4, %v797_v51, 0.0 }
  0xbb   :  { %v347_v47 = vpop.f32.mrf.mxu1  ;;  %v217_v33 = vadd.f32 %v216_v15, %v215_v18  ;;  %v272_v43 = vadd.f32 %v271_v26, %v270_v29  ;;  %v468_v38 = vadd.f32 %v467_v30, %v466_v23  ;;  %v281_v26 = vsel %vm206_vm4, %v256_v10, 0.0 }
  0xbc   :  { %v377_v54 = vpack.c.bf16 %v347_v47, %v347_v47  ;;  %v447_v19 = vmul.f32 %v347_v47, %v347_v47  ;;  %v415_v35 = vsel %vm206_vm4, %v347_v47, 0.0 }
  0xbd   :  { %v932_v59 = vpop.f32.mrf.mxu2  ;;  %v416_v60 = vadd.f32 %v415_v35, %v414_v28  ;;  %v429_v35 = vsel %vm206_vm4, %v787_v48, 0.0 }
  0xbe   :  { %393 = vst.msk [vmem:[%s1072_s5 + $0x1c] sm:$0xf] %vm189_vm3, %v377_v54  ;;  %v186_v36 = vpack.c.bf16 %v932_v59, %v932_v59  ;;  %v469_v50 = vsel %vm206_vm4, %v447_v19, 0.0 }
  0xbf   :  { %v148_v1 = vpop.f32.mrf.mxu0  ;;  %v470_v2 = vadd.f32 %v469_v50, %v468_v38 }
  0xc0   :  { %v179_v6 = vpack.c.bf16 %v148_v1, %v148_v1  ;;  %203 = vst.msk [vmem:[%s1073_s3 + $0x34] sm:$0xf] %vm189_vm3, %v186_v36  ;;  %v252_v55 = vmul.f32 %v148_v1, %v148_v1  ;;  %v218_v27 = vsel %vm206_vm4, %v148_v1, 0.0 }
  0xc1   :  { %v219_v52 = vadd.f32 %v218_v27, %v217_v33  ;;  %v258_v27 = vmul.f32 %v864_v14, %v864_v14  ;;  %v259_v33 = vmul.f32 %v932_v59, %v932_v59 }
  0xc2   :  { %196 = vst.msk [vmem:[%s1073_s3 + $0x18] sm:$0xf] %vm189_vm3, %v179_v6  ;;  %v273_v39 = vsel %vm206_vm4, %v252_v55, 0.0 }
  0xc3   :  { %v350_v20 = vpop.f32.mrf.mxu1  ;;  %v274_v62 = vadd.f32 %v273_v39, %v272_v43  ;;  %v454_v43 = vmul.f32 %v787_v48, %v787_v48 }
  0xc4   :  { %v378_v24 = vpack.c.bf16 %v350_v20, %v350_v20  ;;  %v448_v5 = vmul.f32 %v350_v20, %v350_v20  ;;  %v417_v56 = vsel %vm206_vm4, %v350_v20, 0.0 }
  0xc5   :  { %v972_v34 = vpop.f32.mrf.mxu2  ;;  %v418_v3 = vadd.f32 %v417_v56, %v416_v60 }
  0xc6   :  { %394 = vst.msk [vmem:[%s1072_s5 + $0x20] sm:$0xf] %vm189_vm3, %v378_v24  ;;  %v187_v41 = vpack.c.bf16 %v972_v34, %v972_v34  ;;  %v471_v46 = vsel %vm206_vm4, %v448_v5, 0.0  ;;  %v481_v24 = vsel %vm206_vm4, %v453_v63, 0.0 }
  0xc7   :  { %v150_v54 = vpop.f32.mrf.mxu0  ;;  %v472_v13 = vadd.f32 %v471_v46, %v470_v2 }
  0xc8   :  { %v180_v47 = vpack.c.bf16 %v150_v54, %v150_v54  ;;  %v220_v58 = vsel %vm206_vm4, %v150_v54, 0.0  ;;  %v253_v32 = vmul.f32 %v150_v54, %v150_v54  ;;  %204 = vst.msk [vmem:[%s1073_s3 + $0x38] sm:$0xf] %vm189_vm3, %v187_v41 }
  0xc9   :  { %v221_v36 = vadd.f32 %v220_v58, %v219_v52 }
  0xca   :  { %197 = vst.msk [vmem:[%s1073_s3 + $0x1c] sm:$0xf] %vm189_vm3, %v180_v47  ;;  %v275_v1 = vsel %vm206_vm4, %v253_v32, 0.0 }
  0xcb   :  { %v223_v4 = vadd.f32 %v899_v31, %v221_v36  ;;  %v276_v6 = vadd.f32 %v275_v1, %v274_v62  ;;  %v352_v9 = vpop.f32.mrf.mxu1  ;;  %v257_v31 = vmul.f32 %v797_v51, %v797_v51  ;;  %v230_v51 = vsel %vm206_vm4, %v864_v14, 0.0 }
  0xcc   :  { %v379_v11 = vpack.c.bf16 %v352_v9, %v352_v9  ;;  %v419_v40 = vsel %vm206_vm4, %v352_v9, 0.0  ;;  %v449_v12 = vmul.f32 %v352_v9, %v352_v9  ;;  %v260_v14 = vmul.f32 %v972_v34, %v972_v34 }
  0xcd   :  { %v225_v49 = vadd.f32 %v927_v57, %v223_v4  ;;  %v278_v15 = vadd.f32 %v904_v37, %v276_v6  ;;  %v420_v55 = vadd.f32 %v419_v40, %v418_v3  ;;  %v170_v16 = vpop.f32.mrf.mxu2  ;;  %v283_v30 = vsel %vm206_vm4, %v257_v31, 0.0 }
  0xce   :  { %395 = vst.msk [vmem:[%s1072_s5 + $0x24] sm:$0xf] %vm189_vm3, %v379_v11  ;;  %v473_v18 = vsel %vm206_vm4, %v449_v12, 0.0  ;;  %v188_v19 = vpack.c.bf16 %v170_v16, %v170_v16  ;;  %v261_v47 = vmul.f32 %v170_v16, %v170_v16  ;;  %v289_v48 = vsel %vm206_vm4, %v260_v14, 0.0 }
  0xcf   :  { %v227_v20 = vadd.f32 %v226_v17, %v225_v49  ;;  %v280_v57 = vadd.f32 %v947_v0, %v278_v15  ;;  %v422_v37 = vadd.f32 %v848_v7, %v420_v55  ;;  %v474_v25 = vadd.f32 %v473_v18, %v472_v13 }
  0xd0   :  { %205 = vst.msk [vmem:[%s1073_s3 + $0x3c] sm:$0xf] %vm189_vm3, %v188_v19  ;;  %v483_v62 = vsel %vm206_vm4, %v454_v43, 0.0  ;;  %v236_v36 = vsel %vm206_vm4, %v170_v16, 0.0  ;;  %v291_v1 = vsel %vm206_vm4, %v261_v47, 0.0 }
  0xd1   :  { %v282_v23 = vadd.f32 %v281_v26, %v280_v57  ;;  %v229_v0 = vadd.f32 %v228_v44, %v227_v20  ;;  %v424_v7 = vadd.f32 %v882_v21, %v422_v37  ;;  %v476_v29 = vadd.f32 %v851_v8, %v474_v25 }
  0xd2   :  { %v285_v21 = vsel %vm206_vm4, %v258_v27, 0.0  ;;  %v232_v8 = vsel %vm206_vm4, %v932_v59, 0.0  ;;  %v455_v59 = vmul.f32 %v822_v61, %v822_v61 }
  0xd3   :  { %v231_v39 = vadd.f32 %v230_v51, %v229_v0  ;;  %v284_v5 = vadd.f32 %v283_v30, %v282_v23  ;;  %v478_v41 = vadd.f32 %v885_v22, %v476_v29  ;;  %v426_v28 = vadd.f32 %v917_v45, %v424_v7 }
  0xd4   :  { %v287_v22 = vsel %vm206_vm4, %v259_v33, 0.0  ;;  %v234_v45 = vsel %vm206_vm4, %v972_v34, 0.0  ;;  %v485_v2 = vsel %vm206_vm4, %v455_v59, 0.0 }
  0xd5   :  { %v233_v50 = vadd.f32 %v232_v8, %v231_v39  ;;  %v286_v52 = vadd.f32 %v285_v21, %v284_v5  ;;  %v428_v54 = vadd.f32 %v427_v42, %v426_v28  ;;  %v480_v56 = vadd.f32 %v923_v53, %v478_v41 }
  0xd6   :  { %v431_v53 = vsel %vm206_vm4, %v822_v61, 0.0 }
  0xd7   :  { %v235_v58 = vadd.f32 %v234_v45, %v233_v50  ;;  %v288_v32 = vadd.f32 %v287_v22, %v286_v52  ;;  %v430_v38 = vadd.f32 %v429_v35, %v428_v54  ;;  %v482_v60 = vadd.f32 %v481_v24, %v480_v56 }
  0xd9   :  { %v290_v42 = vadd.f32 %v289_v48, %v288_v32  ;;  %v237_v63 = vadd.f32 %v236_v36, %v235_v58  ;;  %v432_v34 = vadd.f32 %v431_v53, %v430_v38  ;;  %v484_v46 = vadd.f32 %v483_v62, %v482_v60 }
  0xdb   :  { %v238_v3 = vrot.slane %v237_v63, 4  ;;  %v292_v4 = vadd.f32 %v291_v1, %v290_v42  ;;  %v433_v6 = vrot.slane %v432_v34, 4  ;;  %v486_v9 = vadd.f32 %v485_v2, %v484_v46 }
  0xdd   :  { %v239_v10 = vadd.f32 %v238_v3, %v237_v63  ;;  %v293_v11 = vrot.slane %v292_v4, 4  ;;  %v434_v40 = vadd.f32 %v433_v6, %v432_v34  ;;  %v487_v12 = vrot.slane %v486_v9, 4 }
  0xdf   :  { %v240_v13 = vrot.slane %v239_v10, 2  ;;  %v294_v49 = vadd.f32 %v293_v11, %v292_v4  ;;  %v435_v15 = vrot.slane %v434_v40, 2  ;;  %v488_v61 = vadd.f32 %v487_v12, %v486_v9 }
  0xe1   :  { %v241_v55 = vadd.f32 %v240_v13, %v239_v10  ;;  %v295_v16 = vrot.slane %v294_v49, 2  ;;  %v436_v17 = vadd.f32 %v435_v15, %v434_v40  ;;  %v489_v31 = vrot.slane %v488_v61, 2 }
  0xe3   :  { %v242_v18 = vrot.slane %v241_v55, 1  ;;  %v296_v19 = vadd.f32 %v295_v16, %v294_v49  ;;  %v437_v20 = vrot.slane %v436_v17, 1  ;;  %v490_v57 = vadd.f32 %v489_v31, %v488_v61 }
  0xe5   :  { %v243_v37 = vadd.f32 %v242_v18, %v241_v55  ;;  %v297_v25 = vrot.slane %v296_v19, 1  ;;  %v438_v26 = vadd.f32 %v437_v20, %v436_v17  ;;  %v491_v44 = vrot.slane %v490_v57, 1 }
  0xe7   :  { %245 = vst.msk [vmem:[%s1074_s4] sm:$0x1] %vm244_vm5, %v243_v37  ;;  %v298_v27 = vadd.f32 %v297_v25, %v296_v19  ;;  %v492_v24 = vadd.f32 %v491_v44, %v490_v57 }
  0xe8   :  { %439 = vst.msk [vmem:[%s1075_s6] sm:$0x1] %vm244_vm5, %v438_v26 }
  0xe9   :  { %299 = vst.msk [vmem:[%s1074_s4 + $0x1] sm:$0x1] %vm244_vm5, %v298_v27 }
  0xea   :  { %493 = vst.msk [vmem:[%s1075_s6 + $0x1] sm:$0x1] %vm244_vm5, %v492_v24 }

// kernel: resnet18_sub_forward.7
= control target key start
LH: loop header
LB: loop body
LE: loop exit
PB: predicated region body
PF: predicated region fallthrough
CT: control target
= control target key end

     0   :  { %vm183_vm0 = vcmask 64512   ;;  %s497_s0 = inlined_call_operand.vmem [shape: bf16[128,8], index: 0, kind: input, shape index: {}]   ;;  %s498_s1 = inlined_call_operand.vmem [shape: f32[2,8], index: 1, kind: input, shape index: {}]   ;;  %s499_s2 = inlined_call_operand.vmem [shape: bf16[128,8], index: 2, kind: input, shape index: {}]   ;;  %s500_s3 = inlined_call_operand.vmem [shape: f32[2,8], index: 3, kind: input, shape index: {}]   ;;  %s501_s4 = inlined_call_operand.vmem [shape: f32[128,8], index: 4, kind: output, shape index: {}]  }
   0x1   :  { %v17_v0 = vld [vmem:[%s498_s1] sm:$0x3]  ;;  %v268_v8 = vld [vmem:[%s497_s0 + $0x8] sm:$0xff]   ;;  %v269_v18 = vld [vmem:[%s497_s0 + $0x10] sm:$0xff]  }
   0x2   :  { %v18_v1 = vld [vmem:[%s500_s3] sm:$0x3]  ;;  %v316_v4 = vperm.slane %v17_v0, 0  ;;  %v318_v5 = vperm.slane %v17_v0, 1  ;;  %v275_v9 = vld [vmem:[%s499_s2 + $0x8] sm:$0xff]   ;;  %v210_v15 = vunpack.c.l.bf16 %v268_v8  ;;  %v211_v17 = vunpack.c.h.bf16 %v268_v8  ;;  %v276_v19 = vld [vmem:[%s499_s2 + $0x10] sm:$0xff]  }
   0x3   :  { %v205_v2 = vld [vmem:[%s497_s0] sm:$0xff]   ;;  %v323_v7 = vperm.slane %v18_v1, 0  ;;  %v331_v11 = vperm.slane %v18_v1, 1  ;;  %v242_v16 = vunpack.c.l.bf16 %v275_v9  ;;  %v243_v23 = vunpack.c.h.bf16 %v275_v9  ;;  %v270_v36 = vld [vmem:[%s497_s0 + $0x18] sm:$0xff]  }
   0x4   :  { %v206_v3 = vunpack.c.l.bf16 %v205_v2  ;;  %v237_v6 = vld [vmem:[%s499_s2] sm:$0xff]   ;;  %v207_v12 = vunpack.c.h.bf16 %v205_v2  ;;  %v54_v25 = vmul.f32 %v210_v15, %v316_v4  ;;  %v55_v27 = vmul.f32 %v211_v17, %v316_v4  ;;  %v277_v45 = vld [vmem:[%s499_s2 + $0x18] sm:$0xff]   ;;  %v279_v17 = vld [vmem:[%s499_s2 + $0x28] sm:$0xff]  }
   0x5   :  { %v238_v10 = vunpack.c.l.bf16 %v237_v6  ;;  %v239_v13 = vunpack.c.h.bf16 %v237_v6  ;;  %v120_v26 = vmul.f32 %v242_v16, %v323_v7  ;;  %v121_v29 = vmul.f32 %v243_v23, %v323_v7  ;;  %v271_v58 = vld [vmem:[%s497_s0 + $0x20] sm:$0xff]  }
   0x6   :  { %v52_v14 = vmul.f32 %v206_v3, %v316_v4  ;;  %v53_v21 = vmul.f32 %v207_v12, %v316_v4  ;;  %v214_v30 = vunpack.c.l.bf16 %v269_v18  ;;  %v246_v31 = vunpack.c.l.bf16 %v276_v19  ;;  %v278_v59 = vld [vmem:[%s499_s2 + $0x20] sm:$0xff]   ;;  %v272_v12 = vld [vmem:[%s497_s0 + $0x28] sm:$0xff]  }
   0x7   :  { %v118_v20 = vmul.f32 %v238_v10, %v323_v7  ;;  %v119_v22 = vmul.f32 %v239_v13, %v323_v7  ;;  %v71_v33 = vadd.f32 %v318_v5, %v54_v25  ;;  %v72_v34 = vadd.f32 %v318_v5, %v55_v27 }
   0x8   :  { %v69_v24 = vadd.f32 %v318_v5, %v52_v14  ;;  %v70_v28 = vadd.f32 %v318_v5, %v53_v21  ;;  %v215_v35 = vunpack.c.h.bf16 %v269_v18  ;;  %v56_v38 = vmul.f32 %v214_v30, %v316_v4  ;;  %v273_v30 = vld [vmem:[%s497_s0 + $0x30] sm:$0xff]  }
   0x9   :  { %v122_v39 = vmul.f32 %v246_v31, %v323_v7  ;;  %v247_v40 = vunpack.c.h.bf16 %v276_v19  ;;  %v136_v42 = vadd.f32 %v120_v26, %v71_v33  ;;  %v137_v43 = vadd.f32 %v121_v29, %v72_v34 }
   0xa   :  { %v134_v32 = vadd.f32 %v118_v20, %v69_v24  ;;  %v135_v37 = vadd.f32 %v119_v22, %v70_v28  ;;  %v57_v44 = vmul.f32 %v215_v35, %v316_v4  ;;  %v73_v47 = vadd.f32 %v318_v5, %v56_v38  ;;  %v280_v35 = vld [vmem:[%s499_s2 + $0x30] sm:$0xff]  }
   0xb   :  { %v123_v48 = vmul.f32 %v247_v40, %v323_v7  ;;  %v218_v49 = vunpack.c.l.bf16 %v270_v36  ;;  %v153_v51 = vadd.f32 %v331_v11, %v136_v42  ;;  %v154_v52 = vadd.f32 %v331_v11, %v137_v43 }
   0xc   :  { %v151_v41 = vadd.f32 %v331_v11, %v134_v32  ;;  %v152_v46 = vadd.f32 %v331_v11, %v135_v37  ;;  %v74_v53 = vadd.f32 %v318_v5, %v57_v44  ;;  %v138_v55 = vadd.f32 %v122_v39, %v73_v47 }
   0xd   :  { %v58_v56 = vmul.f32 %v218_v49, %v316_v4  ;;  %v250_v57 = vunpack.c.l.bf16 %v277_v45  ;;  %v169_v60 = vmax.f32 %v153_v51, 0.0  ;;  %v170_v61 = vmax.f32 %v154_v52, 0.0  ;;  %v274_v52 = vld [vmem:[%s497_s0 + $0x38] sm:$0xff]  }
   0xe   :  { %v167_v50 = vmax.f32 %v151_v41, 0.0  ;;  %v168_v54 = vmax.f32 %v152_v46, 0.0  ;;  %v139_v62 = vadd.f32 %v123_v48, %v74_v53  ;;  %v219_v63 = vunpack.c.h.bf16 %v270_v36  ;;  %v281_v53 = vld [vmem:[%s499_s2 + $0x38] sm:$0xff]  }
   0xf   :  { %v155_v0 = vadd.f32 %v331_v11, %v138_v55  ;;  %v75_v1 = vadd.f32 %v318_v5, %v58_v56  ;;  %v124_v2 = vmul.f32 %v250_v57, %v323_v7  ;;  %v251_v3 = vunpack.c.h.bf16 %v277_v45  ;;  %186 = vst.msk [vmem:[%s501_s4 + $0x10] sm:$0xff] %vm183_vm0, %v169_v60 }
  0x10   :  { %184 = vst.msk [vmem:[%s501_s4] sm:$0xff] %vm183_vm0, %v167_v50  ;;  %v156_v6 = vadd.f32 %v331_v11, %v139_v62  ;;  %v59_v8 = vmul.f32 %v219_v63, %v316_v4  ;;  %v222_v9 = vunpack.c.l.bf16 %v271_v58  ;;  %v254_v10 = vunpack.c.l.bf16 %v278_v59 }
  0x11   :  { %185 = vst.msk [vmem:[%s501_s4 + $0x8] sm:$0xff] %vm183_vm0, %v168_v54  ;;  %v171_v13 = vmax.f32 %v155_v0, 0.0  ;;  %v140_v14 = vadd.f32 %v124_v2, %v75_v1  ;;  %v125_v15 = vmul.f32 %v251_v3, %v323_v7  ;;  %v223_v16 = vunpack.c.h.bf16 %v271_v58 }
  0x12   :  { %187 = vst.msk [vmem:[%s501_s4 + $0x18] sm:$0xff] %vm183_vm0, %v170_v61  ;;  %v172_v18 = vmax.f32 %v156_v6, 0.0  ;;  %v76_v19 = vadd.f32 %v318_v5, %v59_v8  ;;  %v60_v20 = vmul.f32 %v222_v9, %v316_v4  ;;  %v126_v21 = vmul.f32 %v254_v10, %v323_v7 }
  0x13   :  { %188 = vst.msk [vmem:[%s501_s4 + $0x20] sm:$0xff] %vm183_vm0, %v171_v13  ;;  %v157_v22 = vadd.f32 %v331_v11, %v140_v14  ;;  %v61_v23 = vmul.f32 %v223_v16, %v316_v4  ;;  %v255_v24 = vunpack.c.h.bf16 %v278_v59  ;;  %v226_v25 = vunpack.c.l.bf16 %v272_v12 }
  0x14   :  { %189 = vst.msk [vmem:[%s501_s4 + $0x28] sm:$0xff] %vm183_vm0, %v172_v18  ;;  %v141_v26 = vadd.f32 %v125_v15, %v76_v19  ;;  %v77_v27 = vadd.f32 %v318_v5, %v60_v20  ;;  %v258_v28 = vunpack.c.l.bf16 %v279_v17  ;;  %v227_v29 = vunpack.c.h.bf16 %v272_v12 }
  0x15   :  { %v173_v31 = vmax.f32 %v157_v22, 0.0  ;;  %v78_v32 = vadd.f32 %v318_v5, %v61_v23  ;;  %v127_v33 = vmul.f32 %v255_v24, %v323_v7  ;;  %v62_v34 = vmul.f32 %v226_v25, %v316_v4 }
  0x16   :  { %v158_v36 = vadd.f32 %v331_v11, %v141_v26  ;;  %v142_v37 = vadd.f32 %v126_v21, %v77_v27  ;;  %v128_v38 = vmul.f32 %v258_v28, %v323_v7  ;;  %v63_v39 = vmul.f32 %v227_v29, %v316_v4 }
  0x17   :  { %190 = vst.msk [vmem:[%s501_s4 + $0x30] sm:$0xff] %vm183_vm0, %v173_v31  ;;  %v143_v40 = vadd.f32 %v127_v33, %v78_v32  ;;  %v79_v41 = vadd.f32 %v318_v5, %v62_v34  ;;  %v259_v42 = vunpack.c.h.bf16 %v279_v17  ;;  %v230_v43 = vunpack.c.l.bf16 %v273_v30 }
  0x18   :  { %v174_v44 = vmax.f32 %v158_v36, 0.0  ;;  %v159_v45 = vadd.f32 %v331_v11, %v142_v37  ;;  %v80_v46 = vadd.f32 %v318_v5, %v63_v39  ;;  %v262_v47 = vunpack.c.l.bf16 %v280_v35 }
  0x19   :  { %v160_v48 = vadd.f32 %v331_v11, %v143_v40  ;;  %v144_v49 = vadd.f32 %v128_v38, %v79_v41  ;;  %v129_v50 = vmul.f32 %v259_v42, %v323_v7  ;;  %v64_v51 = vmul.f32 %v230_v43, %v316_v4 }
  0x1a   :  { %191 = vst.msk [vmem:[%s501_s4 + $0x38] sm:$0xff] %vm183_vm0, %v174_v44  ;;  %v175_v54 = vmax.f32 %v159_v45, 0.0  ;;  %v130_v55 = vmul.f32 %v262_v47, %v323_v7  ;;  %v231_v56 = vunpack.c.h.bf16 %v273_v30  ;;  %v263_v57 = vunpack.c.h.bf16 %v280_v35 }
  0x1b   :  { %v176_v58 = vmax.f32 %v160_v48, 0.0  ;;  %v161_v59 = vadd.f32 %v331_v11, %v144_v49  ;;  %v145_v60 = vadd.f32 %v129_v50, %v80_v46  ;;  %v81_v61 = vadd.f32 %v318_v5, %v64_v51 }
  0x1c   :  { %192 = vst.msk [vmem:[%s501_s4 + $0x40] sm:$0xff] %vm183_vm0, %v175_v54  ;;  %v65_v62 = vmul.f32 %v231_v56, %v316_v4  ;;  %v131_v63 = vmul.f32 %v263_v57, %v323_v7  ;;  %v234_v0 = vunpack.c.l.bf16 %v274_v52  ;;  %v266_v1 = vunpack.c.l.bf16 %v281_v53 }
  0x1d   :  { %193 = vst.msk [vmem:[%s501_s4 + $0x48] sm:$0xff] %vm183_vm0, %v176_v58  ;;  %v177_v2 = vmax.f32 %v161_v59, 0.0  ;;  %v162_v3 = vadd.f32 %v331_v11, %v145_v60  ;;  %v146_v6 = vadd.f32 %v130_v55, %v81_v61  ;;  %v235_v8 = vunpack.c.h.bf16 %v274_v52 }
  0x1e   :  { %v82_v9 = vadd.f32 %v318_v5, %v65_v62  ;;  %v66_v10 = vmul.f32 %v234_v0, %v316_v4  ;;  %v132_v12 = vmul.f32 %v266_v1, %v323_v7  ;;  %v267_v13 = vunpack.c.h.bf16 %v281_v53 }
  0x1f   :  { %194 = vst.msk [vmem:[%s501_s4 + $0x50] sm:$0xff] %vm183_vm0, %v177_v2  ;;  %v178_v14 = vmax.f32 %v162_v3, 0.0  ;;  %v163_v15 = vadd.f32 %v331_v11, %v146_v6  ;;  %v67_v16 = vmul.f32 %v235_v8, %v316_v4 }
  0x20   :  { %v147_v17 = vadd.f32 %v131_v63, %v82_v9  ;;  %v83_v18 = vadd.f32 %v318_v5, %v66_v10  ;;  %v133_v19 = vmul.f32 %v267_v13, %v323_v7 }
  0x21   :  { %195 = vst.msk [vmem:[%s501_s4 + $0x58] sm:$0xff] %vm183_vm0, %v178_v14  ;;  %v179_v20 = vmax.f32 %v163_v15, 0.0  ;;  %v84_v21 = vadd.f32 %v318_v5, %v67_v16 }
  0x22   :  { %v164_v22 = vadd.f32 %v331_v11, %v147_v17  ;;  %v148_v23 = vadd.f32 %v132_v12, %v83_v18 }
  0x23   :  { %196 = vst.msk [vmem:[%s501_s4 + $0x60] sm:$0xff] %vm183_vm0, %v179_v20  ;;  %v149_v4 = vadd.f32 %v133_v19, %v84_v21 }
  0x24   :  { %v180_v24 = vmax.f32 %v164_v22, 0.0  ;;  %v165_v7 = vadd.f32 %v331_v11, %v148_v23 }
  0x25   :  { %v166_v25 = vadd.f32 %v331_v11, %v149_v4 }
  0x26   :  { %197 = vst.msk [vmem:[%s501_s4 + $0x68] sm:$0xff] %vm183_vm0, %v180_v24  ;;  %v181_v5 = vmax.f32 %v165_v7, 0.0 }
  0x27   :  { %v182_v26 = vmax.f32 %v166_v25, 0.0 }
  0x28   :  { %198 = vst.msk [vmem:[%s501_s4 + $0x70] sm:$0xff] %vm183_vm0, %v181_v5 }
  0x29   :  { %199 = vst.msk [vmem:[%s501_s4 + $0x78] sm:$0xff] %vm183_vm0, %v182_v26 }

// kernel: resnet18_sub_forward.6
= control target key start
LH: loop header
LB: loop body
LE: loop exit
PB: predicated region body
PF: predicated region fallthrough
CT: control target
= control target key end

     0   :  { %vm131_vm0 = vcmask 1043456   ;;  %vm106_vm1 = vcmask 588800   ;;  %vm200_vm2 = vcmask 60416   ;;  %vm217_vm3 = vcmask 64512   ;;  %s606_s1 = inlined_call_operand.vmem [shape: bf16[72,8], index: 1, kind: input, shape index: {}]   ;;  %s607_s0 = inlined_call_operand.vmem [shape: bf16[128,72], index: 0, kind: input, shape index: {}]   ;;  %s608_s2 = inlined_call_operand.vmem [shape: bf16[128,8], index: 2, kind: output, shape index: {0}]   ;;  %s609_s3 = inlined_call_operand.vmem [shape: f32[1,2,8], index: 3, kind: output, shape index: {1}]  }
   0x1   :  { %v38_v0 = vld [vmem:[%s606_s1 + $0x20] sm:$0xf]  ;;  %v386_v4 = vld [vmem:[%s606_s1 + $0x18] sm:$0xff]  ;;  %v385_v5 = vld [vmem:[%s606_s1 + $0x10] sm:$0xff]  ;;  %vm255_vm4 = vcmask 57344  }
   0x2   :  { %v96_v1 = vunpack.c.l.b16 %v38_v0  ;;  %v384_v6 = vld [vmem:[%s606_s1 + $0x8] sm:$0xff]  ;;  %v383_v7 = vld [vmem:[%s606_s1] sm:$0xff]  ;;  %v377_v9 = vld [vmem:[%s607_s0 + $0x10] sm:$0xff] }
   0x3   :  { %v375_v8 = vld [vmem:[%s607_s0] sm:$0xff]  ;;  %v381_v11 = vld [vmem:[%s607_s0 + $0x30] sm:$0xff]  ;;  %v376_v12 = vld [vmem:[%s607_s0 + $0x8] sm:$0xff] }
   0x4   :  { %v101_v2 = vpack.c.b16 %v96_v1, %v96_v1  ;;  %v379_v10 = vld [vmem:[%s607_s0 + $0x20] sm:$0xff]  ;;  %v378_v13 = vld [vmem:[%s607_s0 + $0x18] sm:$0xff]  ;;  %v380_v14 = vld [vmem:[%s607_s0 + $0x28] sm:$0xff] }
   0x5   :  { %v382_v15 = vld [vmem:[%s607_s0 + $0x38] sm:$0xff] }
   0x6   :  { %v133_v3 = vsel %vm131_vm0, %v101_v2, 0 }
   0x7   :  { %138 = vmatpush.bf16.msra.mxu0 %v133_v3  ;;  %387 = vmatpush.bf16.msra.mxu1 %v133_v3 }
   0x8   :  { %388 = vmatpush.bf16.msra.mxu2 %v133_v3  ;;  %389 = vmatpush.bf16.msra.mxu3 %v133_v3 }
   0xb   :  { %139 = vmatpush.bf16.msra.mxu0 %v386_v4  ;;  %390 = vmatpush.bf16.msra.mxu1 %v386_v4 }
   0xc   :  { %391 = vmatpush.bf16.msra.mxu2 %v386_v4  ;;  %392 = vmatpush.bf16.msra.mxu3 %v386_v4 }
   0xf   :  { %140 = vmatpush.bf16.msra.mxu0 %v385_v5  ;;  %393 = vmatpush.bf16.msra.mxu1 %v385_v5 }
  0x10   :  { %394 = vmatpush.bf16.msra.mxu2 %v385_v5  ;;  %395 = vmatpush.bf16.msra.mxu3 %v385_v5 }
  0x13   :  { %141 = vmatpush.bf16.msra.mxu0 %v384_v6  ;;  %396 = vmatpush.bf16.msra.mxu1 %v384_v6 }
  0x14   :  { %397 = vmatpush.bf16.msra.mxu2 %v384_v6  ;;  %398 = vmatpush.bf16.msra.mxu3 %v384_v6 }
  0x17   :  { %142 = vmatpush.bf16.msra.mxu0 %v383_v7  ;;  %399 = vmatpush.bf16.msra.mxu1 %v383_v7 }
  0x18   :  { %400 = vmatpush.bf16.msra.mxu2 %v383_v7  ;;  %401 = vmatpush.bf16.msra.mxu3 %v383_v7 }
  0x1a   :  { %367 = vmatmul.msk.bf16.vlgmr.msra.gmra.mxu0 %vm106_vm1, %v375_v8  ;;  %369 = vmatmul.msk.bf16.vlgmr.msra.gmra.mxu1 %vm106_vm1, %v377_v9 }
  0x1b   :  { %371 = vmatmul.msk.bf16.vlgmr.msra.gmra.mxu2 %vm106_vm1, %v379_v10  ;;  %373 = vmatmul.msk.bf16.vlgmr.msra.gmra.mxu3 %vm106_vm1, %v381_v11 }
  0x2a   :  { %368 = vmatmul.msk.bf16.gmra.mxu0 %vm106_vm1, %v376_v12  ;;  %370 = vmatmul.msk.bf16.gmra.mxu1 %vm106_vm1, %v378_v13 }
  0x2b   :  { %372 = vmatmul.msk.bf16.gmra.mxu2 %vm106_vm1, %v380_v14  ;;  %374 = vmatmul.msk.bf16.gmra.mxu3 %vm106_vm1, %v382_v15 }
  0x97   :  { %v144_v16 = vpop.f32.mrf.mxu0  ;;  %v154_v17 = vpop.f32.mrf.mxu1 }
  0x98   :  { %v184_v18 = vpack.c.bf16 %v144_v16, %v144_v16  ;;  %v188_v19 = vpack.c.bf16 %v154_v17, %v154_v17  ;;  %v257_v37 = vmul.f32 %v144_v16, %v144_v16  ;;  %v218_v40 = vsel %vm217_vm3, %v144_v16, 0.0 }
  0x99   :  { %v261_v45 = vmul.f32 %v154_v17, %v154_v17  ;;  %v225_v61 = vsel %vm217_vm3, %v154_v17, 0.0 }
  0x9a   :  { %201 = vst.msk [vmem:[%s608_s2] sm:$0xf] %vm200_vm2, %v184_v18  ;;  %v273_v44 = vsel %vm217_vm3, %v257_v37, 0.0 }
  0x9b   :  { %205 = vst.msk [vmem:[%s608_s2 + $0x10] sm:$0xf] %vm200_vm2, %v188_v19  ;;  %v280_v2 = vsel %vm217_vm3, %v261_v45, 0.0 }
  0x9e   :  { %v477_v20 = vpop.f32.mrf.mxu2  ;;  %v479_v21 = vpop.f32.mrf.mxu3 }
  0x9f   :  { %v146_v22 = vpop.f32.mrf.mxu0  ;;  %v156_v23 = vpop.f32.mrf.mxu1  ;;  %v192_v24 = vpack.c.bf16 %v477_v20, %v477_v20  ;;  %v196_v27 = vpack.c.bf16 %v479_v21, %v479_v21  ;;  %v265_v15 = vmul.f32 %v477_v20, %v477_v20 }
  0xa0   :  { %v185_v25 = vpack.c.bf16 %v146_v22, %v146_v22  ;;  %v189_v26 = vpack.c.bf16 %v156_v23, %v156_v23  ;;  %v258_v33 = vmul.f32 %v146_v22, %v146_v22  ;;  %v219_v38 = vsel %vm217_vm3, %v146_v22, 0.0 }
  0xa1   :  { %209 = vst.msk [vmem:[%s608_s2 + $0x20] sm:$0xf] %vm200_vm2, %v192_v24  ;;  %v220_v43 = vadd.f32 %v219_v38, %v218_v40  ;;  %v262_v62 = vmul.f32 %v156_v23, %v156_v23  ;;  %v227_v3 = vsel %vm217_vm3, %v156_v23, 0.0  ;;  %v233_v23 = vsel %vm217_vm3, %v477_v20, 0.0 }
  0xa2   :  { %202 = vst.msk [vmem:[%s608_s2 + $0x4] sm:$0xf] %vm200_vm2, %v185_v25  ;;  %v274_v41 = vsel %vm217_vm3, %v258_v33, 0.0 }
  0xa3   :  { %206 = vst.msk [vmem:[%s608_s2 + $0x14] sm:$0xf] %vm200_vm2, %v189_v26  ;;  %v275_v49 = vadd.f32 %v274_v41, %v273_v44  ;;  %v282_v7 = vsel %vm217_vm3, %v262_v62, 0.0 }
  0xa4   :  { %213 = vst.msk [vmem:[%s608_s2 + $0x30] sm:$0xf] %vm200_vm2, %v196_v27 }
  0xa6   :  { %v501_v28 = vpop.f32.mrf.mxu2  ;;  %v503_v29 = vpop.f32.mrf.mxu3 }
  0xa7   :  { %v149_v30 = vpop.f32.mrf.mxu0  ;;  %v159_v31 = vpop.f32.mrf.mxu1  ;;  %v193_v32 = vpack.c.bf16 %v501_v28, %v501_v28  ;;  %v197_v36 = vpack.c.bf16 %v503_v29, %v503_v29  ;;  %v266_v24 = vmul.f32 %v501_v28, %v501_v28  ;;  %v270_v44 = vmul.f32 %v503_v29, %v503_v29 }
  0xa8   :  { %v186_v34 = vpack.c.bf16 %v149_v30, %v149_v30  ;;  %v190_v35 = vpack.c.bf16 %v159_v31, %v159_v31  ;;  %v259_v39 = vmul.f32 %v149_v30, %v149_v30  ;;  %v221_v42 = vsel %vm217_vm3, %v149_v30, 0.0 }
  0xa9   :  { %210 = vst.msk [vmem:[%s608_s2 + $0x24] sm:$0xf] %vm200_vm2, %v193_v32  ;;  %v222_v50 = vadd.f32 %v221_v42, %v220_v43  ;;  %v263_v4 = vmul.f32 %v159_v31, %v159_v31  ;;  %v229_v8 = vsel %vm217_vm3, %v159_v31, 0.0  ;;  %v288_v30 = vsel %vm217_vm3, %v265_v15, 0.0 }
  0xaa   :  { %203 = vst.msk [vmem:[%s608_s2 + $0x8] sm:$0xf] %vm200_vm2, %v186_v34  ;;  %v276_v46 = vsel %vm217_vm3, %v259_v39, 0.0  ;;  %v235_v31 = vsel %vm217_vm3, %v501_v28, 0.0  ;;  %v290_v34 = vsel %vm217_vm3, %v266_v24, 0.0  ;;  %v269_v39 = vmul.f32 %v479_v21, %v479_v21 }
  0xab   :  { %207 = vst.msk [vmem:[%s608_s2 + $0x18] sm:$0xf] %vm200_vm2, %v190_v35  ;;  %v277_v59 = vadd.f32 %v276_v46, %v275_v49  ;;  %v284_v16 = vsel %vm217_vm3, %v263_v4, 0.0  ;;  %v241_v28 = vsel %vm217_vm3, %v479_v21, 0.0 }
  0xac   :  { %214 = vst.msk [vmem:[%s608_s2 + $0x34] sm:$0xf] %vm200_vm2, %v197_v36  ;;  %v296_v49 = vsel %vm217_vm3, %v269_v39, 0.0 }
  0xae   :  { %v169_v47 = vpop.f32.mrf.mxu2  ;;  %v531_v48 = vpop.f32.mrf.mxu3 }
  0xaf   :  { %v151_v51 = vpop.f32.mrf.mxu0  ;;  %v161_v52 = vpop.f32.mrf.mxu1  ;;  %v194_v53 = vpack.c.bf16 %v169_v47, %v169_v47  ;;  %v198_v54 = vpack.c.bf16 %v531_v48, %v531_v48  ;;  %v267_v32 = vmul.f32 %v169_v47, %v169_v47  ;;  %v237_v35 = vsel %vm217_vm3, %v169_v47, 0.0 }
  0xb0   :  { %v187_v55 = vpack.c.bf16 %v151_v51, %v151_v51  ;;  %v223_v56 = vsel %vm217_vm3, %v151_v51, 0.0  ;;  %v260_v57 = vmul.f32 %v151_v51, %v151_v51  ;;  %v191_v58 = vpack.c.bf16 %v161_v52, %v161_v52 }
  0xb1   :  { %v224_v60 = vadd.f32 %v223_v56, %v222_v50  ;;  %211 = vst.msk [vmem:[%s608_s2 + $0x28] sm:$0xf] %vm200_vm2, %v194_v53  ;;  %v264_v9 = vmul.f32 %v161_v52, %v161_v52  ;;  %v231_v17 = vsel %vm217_vm3, %v161_v52, 0.0  ;;  %v292_v40 = vsel %vm217_vm3, %v267_v32, 0.0 }
  0xb2   :  { %204 = vst.msk [vmem:[%s608_s2 + $0xc] sm:$0xf] %vm200_vm2, %v187_v55  ;;  %v278_v63 = vsel %vm217_vm3, %v260_v57, 0.0  ;;  %v243_v50 = vsel %vm217_vm3, %v503_v29, 0.0  ;;  %v271_v51 = vmul.f32 %v531_v48, %v531_v48  ;;  %v245_v21 = vsel %vm217_vm3, %v531_v48, 0.0 }
  0xb3   :  { %v226_v0 = vadd.f32 %v225_v61, %v224_v60  ;;  %v279_v1 = vadd.f32 %v278_v63, %v277_v59  ;;  %208 = vst.msk [vmem:[%s608_s2 + $0x1c] sm:$0xf] %vm200_vm2, %v191_v58  ;;  %v286_v25 = vsel %vm217_vm3, %v264_v9, 0.0 }
  0xb4   :  { %215 = vst.msk [vmem:[%s608_s2 + $0x38] sm:$0xf] %vm200_vm2, %v198_v54  ;;  %v298_v54 = vsel %vm217_vm3, %v270_v44, 0.0  ;;  %v300_v58 = vsel %vm217_vm3, %v271_v51, 0.0 }
  0xb5   :  { %v281_v5 = vadd.f32 %v280_v2, %v279_v1  ;;  %v228_v6 = vadd.f32 %v227_v3, %v226_v0 }
  0xb6   :  { %v171_v10 = vpop.f32.mrf.mxu2  ;;  %v181_v11 = vpop.f32.mrf.mxu3 }
  0xb7   :  { %v230_v12 = vadd.f32 %v229_v8, %v228_v6  ;;  %v283_v13 = vadd.f32 %v282_v7, %v281_v5  ;;  %v195_v14 = vpack.c.bf16 %v171_v10, %v171_v10  ;;  %v199_v18 = vpack.c.bf16 %v181_v11, %v181_v11 }
  0xb8   :  { %v268_v36 = vmul.f32 %v171_v10, %v171_v10  ;;  %v239_v41 = vsel %vm217_vm3, %v171_v10, 0.0  ;;  %v272_v55 = vmul.f32 %v181_v11, %v181_v11  ;;  %v247_v59 = vsel %vm217_vm3, %v181_v11, 0.0 }
  0xb9   :  { %v232_v19 = vadd.f32 %v231_v17, %v230_v12  ;;  %v285_v22 = vadd.f32 %v284_v16, %v283_v13  ;;  %212 = vst.msk [vmem:[%s608_s2 + $0x2c] sm:$0xf] %vm200_vm2, %v195_v14 }
  0xba   :  { %216 = vst.msk [vmem:[%s608_s2 + $0x3c] sm:$0xf] %vm200_vm2, %v199_v18  ;;  %v294_v45 = vsel %vm217_vm3, %v268_v36, 0.0  ;;  %v302_v29 = vsel %vm217_vm3, %v272_v55, 0.0 }
  0xbb   :  { %v234_v26 = vadd.f32 %v233_v23, %v232_v19  ;;  %v287_v27 = vadd.f32 %v286_v25, %v285_v22 }
  0xbd   :  { %v289_v33 = vadd.f32 %v288_v30, %v287_v27  ;;  %v236_v20 = vadd.f32 %v235_v31, %v234_v26 }
  0xbf   :  { %v238_v37 = vadd.f32 %v237_v35, %v236_v20  ;;  %v291_v38 = vadd.f32 %v290_v34, %v289_v33 }
  0xc1   :  { %v293_v42 = vadd.f32 %v292_v40, %v291_v38  ;;  %v240_v43 = vadd.f32 %v239_v41, %v238_v37 }
  0xc3   :  { %v242_v46 = vadd.f32 %v241_v28, %v240_v43  ;;  %v295_v47 = vadd.f32 %v294_v45, %v293_v42 }
  0xc5   :  { %v297_v52 = vadd.f32 %v296_v49, %v295_v47  ;;  %v244_v53 = vadd.f32 %v243_v50, %v242_v46 }
  0xc7   :  { %v246_v56 = vadd.f32 %v245_v21, %v244_v53  ;;  %v299_v57 = vadd.f32 %v298_v54, %v297_v52 }
  0xc9   :  { %v301_v60 = vadd.f32 %v300_v58, %v299_v57  ;;  %v248_v61 = vadd.f32 %v247_v59, %v246_v56 }
  0xcb   :  { %v249_v62 = vrot.slane %v248_v61, 4  ;;  %v303_v63 = vadd.f32 %v302_v29, %v301_v60 }
  0xcd   :  { %v250_v0 = vadd.f32 %v249_v62, %v248_v61  ;;  %v304_v1 = vrot.slane %v303_v63, 4 }
  0xcf   :  { %v251_v2 = vrot.slane %v250_v0, 2  ;;  %v305_v3 = vadd.f32 %v304_v1, %v303_v63 }
  0xd1   :  { %v252_v4 = vadd.f32 %v251_v2, %v250_v0  ;;  %v306_v5 = vrot.slane %v305_v3, 2 }
  0xd3   :  { %v253_v48 = vrot.slane %v252_v4, 1  ;;  %v307_v6 = vadd.f32 %v306_v5, %v305_v3 }
  0xd5   :  { %v254_v7 = vadd.f32 %v253_v48, %v252_v4  ;;  %v308_v8 = vrot.slane %v307_v6, 1 }
  0xd7   :  { %256 = vst.msk [vmem:[%s609_s3] sm:$0x1] %vm255_vm4, %v254_v7  ;;  %v309_v9 = vadd.f32 %v308_v8, %v307_v6 }
  0xd9   :  { %310 = vst.msk [vmem:[%s609_s3 + $0x1] sm:$0x1] %vm255_vm4, %v309_v9 }

</bundles_post_ra>
